<compile_context>
chip_gen: v7x
topology: tpu7x:2x2x1
jax: 0.10.0
libtpu: 0.0.40
codegen_flags: <defaults>
</compile_context>

<pallas_src>
import functools
import math

import jax
import jax.numpy as jnp
from jax import lax
from jax.experimental import pallas as pl
from jax.experimental.pallas import tpu as pltpu

VMEM_LIMIT_BYTES = 48 * 1024 * 1024
NEG_INF_FILL = -1e9      # matches masked_fill(..., -1e9) on the f32 path of the module


def _pick_tile(dim, preferred):
    """Largest preferred tile that evenly splits `dim`, else the full dim."""
    for t in preferred:
        if t < dim and dim % t == 0:
            return t
    return dim


# ------------------------------ layer norm -----------------------------------
def _layernorm_kernel(x_ref, ab_ref, o_ref, *, epsilon):
    x = x_ref[...].astype(jnp.float32)                    # (tm, D)
    d = x.shape[-1]
    mean = jnp.mean(x, axis=-1, keepdims=True)
    centered = x - mean
    # torch.std is unbiased (ddof=1); formula is (x - mean) / (std + eps).
    var = jnp.sum(centered * centered, axis=-1, keepdims=True) * (1.0 / (d - 1))
    y = centered / (jnp.sqrt(var) + epsilon)
    o_ref[...] = (ab_ref[0] * y + ab_ref[1]).astype(o_ref.dtype)


def layernorm(x2d, alpha, beta, *, epsilon=1e-6):
    m, d = x2d.shape
    tm = _pick_tile(m, (512, 256, 128))
    ab = jnp.stack([jnp.asarray(alpha, jnp.float32).reshape(()),
                    jnp.asarray(beta, jnp.float32).reshape(())])   # (2,)
    return pl.pallas_call(
        functools.partial(_layernorm_kernel, epsilon=epsilon),
        out_shape=jax.ShapeDtypeStruct((m, d), jnp.float32),
        grid_spec=pltpu.PrefetchScalarGridSpec(
            num_scalar_prefetch=0,
            grid=(m // tm,),
            in_specs=[
                pl.BlockSpec((tm, d), lambda i: (i, 0)),
                pl.BlockSpec((2,), lambda i: (0,),
                             memory_space=pltpu.MemorySpace.SMEM),
            ],
            out_specs=pl.BlockSpec((tm, d), lambda i: (i, 0)),
        ),
        compiler_params=pltpu.CompilerParams(
            dimension_semantics=("parallel",),
            vmem_limit_bytes=VMEM_LIMIT_BYTES),
    )(x2d, ab)


# ------------------------------ tiled linear ----------------------------------
def _linear_kernel(*refs, activation, has_residual):
    if has_residual:
        x_ref, w_ref, b_ref, res_ref, o_ref, acc_ref = refs
    else:
        x_ref, w_ref, b_ref, o_ref, acc_ref = refs
        res_ref = None

    @pl.when(pl.program_id(2) == 0)
    def _():
        acc_ref[...] = jnp.zeros_like(acc_ref)

    acc_ref[...] += jnp.dot(x_ref[...], w_ref[...],
                            preferred_element_type=jnp.float32)

    @pl.when(pl.program_id(2) == pl.num_programs(2) - 1)
    def _():
        r = acc_ref[...] + b_ref[...].astype(jnp.float32)
        if activation == "relu":
            r = jnp.maximum(r, 0.0)
        if has_residual:
            r = r + res_ref[...].astype(jnp.float32)
        o_ref[...] = r.astype(o_ref.dtype)


def linear(x2d, w_t, b, *, activation=None, residual=None,
           compute_dtype=jnp.float32, out_dtype=jnp.float32):
    """x2d: (M, K); w_t: (K, N) (weight stored transposed); b: (N,)."""
    m, k = x2d.shape
    k2, n = w_t.shape
    assert k == k2
    tm = _pick_tile(m, (512, 256, 128))
    tn = _pick_tile(n, (512, 256, 128))
    tk = _pick_tile(k, (512, 256, 128))

    inputs = [x2d.astype(compute_dtype), w_t.astype(compute_dtype),
              b.reshape(1, n).astype(jnp.float32)]
    in_specs = [
        pl.BlockSpec((tm, tk), lambda i, j, kk: (i, kk)),
        pl.BlockSpec((tk, tn), lambda i, j, kk: (kk, j)),
        pl.BlockSpec((1, tn), lambda i, j, kk: (0, j)),
    ]
    if residual is not None:
        inputs.append(residual.astype(jnp.float32))
        in_specs.append(pl.BlockSpec((tm, tn), lambda i, j, kk: (i, j)))

    kern = functools.partial(_linear_kernel, activation=activation,
                             has_residual=residual is not None)
    return pl.pallas_call(
        kern,
        out_shape=jax.ShapeDtypeStruct((m, n), out_dtype),
        grid_spec=pltpu.PrefetchScalarGridSpec(
            num_scalar_prefetch=0,
            grid=(m // tm, n // tn, k // tk),
            in_specs=in_specs,
            out_specs=pl.BlockSpec((tm, tn), lambda i, j, kk: (i, j)),
            scratch_shapes=[pltpu.VMEM((tm, tn), jnp.float32)],
        ),
        compiler_params=pltpu.CompilerParams(
            dimension_semantics=("parallel", "parallel", "arbitrary"),
            vmem_limit_bytes=VMEM_LIMIT_BYTES),
    )(*inputs)


# ------------------------- multi-head attention core --------------------------
def _mha_kernel(q_ref, k_ref, v_ref, mask_ref, o_ref,
                m_scr, l_scr, acc_scr, *, num_heads, d_keys):
    kv_idx = pl.program_id(2)

    @pl.when(kv_idx == 0)
    def _():
        m_scr[...] = jnp.full_like(m_scr, -jnp.inf)
        l_scr[...] = jnp.zeros_like(l_scr)
        acc_scr[...] = jnp.zeros_like(acc_scr)

    q = q_ref[0]                                   # (tq, D) compute dtype
    k = k_ref[0]                                   # (tk, D)
    v = v_ref[0]                                   # (tk, D)
    valid = mask_ref[0] != 0                       # (tq, tk)
    scale = 1.0 / math.sqrt(d_keys)

    for h in range(num_heads):                     # heads sliced along lane dim
        cols = slice(h * d_keys, (h + 1) * d_keys)
        # q_h @ k_h^T: contract the last dims of both — no transposed copy of k.
        s = lax.dot_general(q[:, cols], k[:, cols],
                            (((1,), (1,)), ((), ())),
                            preferred_element_type=jnp.float32) * scale
        s = jnp.where(valid, s, NEG_INF_FILL)      # masked_fill(mask == 0, -1e9)
        m_prev = m_scr[:, h:h + 1]                 # (tq, 1)
        m_new = jnp.maximum(m_prev, jnp.max(s, axis=-1, keepdims=True))
        alpha = jnp.exp(m_prev - m_new)
        p = jnp.exp(s - m_new)                     # f32 softmax epilogue
        l_scr[:, h:h + 1] = alpha * l_scr[:, h:h + 1] + jnp.sum(
            p, axis=-1, keepdims=True)
        acc_scr[:, cols] = alpha * acc_scr[:, cols] + jnp.dot(
            p.astype(v.dtype), v[:, cols], preferred_element_type=jnp.float32)
        m_scr[:, h:h + 1] = m_new

    @pl.when(kv_idx == pl.num_programs(2) - 1)
    def _():
        inv_l = pl.reciprocal(l_scr[...], approx=True)     # (tq, H), EUP slot
        parts = []
        for h in range(num_heads):
            cols = slice(h * d_keys, (h + 1) * d_keys)
            parts.append(acc_scr[:, cols] * inv_l[:, h:h + 1])
        # one lane-dense (tq, D) store; heads already concatenated along D.
        o_ref[0] = jnp.concatenate(parts, axis=-1).astype(o_ref.dtype)


def multi_head_attention_core(q, k, v, mask_i8, num_heads, *,
                              compute_dtype=jnp.float32):
    """q, k, v: (B, S, D); mask_i8: (B, S, S) int8 (0 == masked out)."""
    b, s, d = q.shape
    dk = d // num_heads
    tq = _pick_tile(s, (256, 128))
    tk = _pick_tile(s, (512, 256, 128))
    kern = functools.partial(_mha_kernel, num_heads=num_heads, d_keys=dk)
    return pl.pallas_call(
        kern,
        out_shape=jax.ShapeDtypeStruct((b, s, d), jnp.float32),
        grid_spec=pltpu.PrefetchScalarGridSpec(
            num_scalar_prefetch=0,
            grid=(b, s // tq, s // tk),
            in_specs=[
                pl.BlockSpec((1, tq, d), lambda bi, qi, ki: (bi, qi, 0)),
                pl.BlockSpec((1, tk, d), lambda bi, qi, ki: (bi, ki, 0)),
                pl.BlockSpec((1, tk, d), lambda bi, qi, ki: (bi, ki, 0)),
                pl.BlockSpec((1, tq, tk), lambda bi, qi, ki: (bi, qi, ki)),
            ],
            out_specs=pl.BlockSpec((1, tq, d), lambda bi, qi, ki: (bi, qi, 0)),
            scratch_shapes=[
                pltpu.VMEM((tq, num_heads), jnp.float32),   # running max (per head)
                pltpu.VMEM((tq, num_heads), jnp.float32),   # running denom (per head)
                pltpu.VMEM((tq, d), jnp.float32),           # running weighted sum
            ],
        ),
        compiler_params=pltpu.CompilerParams(
            dimension_semantics=("parallel", "parallel", "arbitrary"),
            vmem_limit_bytes=VMEM_LIMIT_BYTES),
    )(q.astype(compute_dtype), k.astype(compute_dtype),
      v.astype(compute_dtype), mask_i8)


# ------------------------------ encoder block ---------------------------------
def init_params(key, d_model, d_ff):
    """nn.Linear-style init U(-1/sqrt(fan_in), 1/sqrt(fan_in)); weights stored (d_in, d_out)."""
    def uniform(k_, shape, fan_in):
        bound = 1.0 / math.sqrt(fan_in)
        return jax.random.uniform(k_, shape, jnp.float32, -bound, bound)

    layers = [("wq", (d_model, d_model), d_model),
              ("wk", (d_model, d_model), d_model),
              ("wv", (d_model, d_model), d_model),
              ("wo", (d_model, d_model), d_model),
              ("w1", (d_model, d_ff), d_model),
              ("w2", (d_ff, d_model), d_ff)]
    params = {}
    for i, (name, shape, fan_in) in enumerate(layers):
        kw, kb = jax.random.split(jax.random.fold_in(key, i))
        params[name] = uniform(kw, shape, fan_in)
        params["b" + name[1:]] = uniform(kb, (shape[1],), fan_in)
    # LayerNormalization params: alpha = 1, beta = 0 (module defaults, scalars).
    params["ln1_alpha"] = jnp.ones((), jnp.float32)
    params["ln1_beta"] = jnp.zeros((), jnp.float32)
    params["ln2_alpha"] = jnp.ones((), jnp.float32)
    params["ln2_beta"] = jnp.zeros((), jnp.float32)
    return params


def encoder_block(params, x, mask, num_heads, *,
                  compute_dtype=jnp.float32, epsilon=1e-6):
    """x: (B, S, d_model); mask: (B, S, S). Returns (B, S, d_model)."""
    b, s, d = x.shape
    x2d = x.reshape(b * s, d)
    mask_i8 = (mask != 0).astype(jnp.int8)        # stream 1 byte/elem instead of 4

    # ---- sublayer 1: x + MHA(LN1(x), LN1(x), LN1(x), mask) -------------------
    h1 = layernorm(x2d, params["ln1_alpha"], params["ln1_beta"], epsilon=epsilon)
    w_qkv = jnp.concatenate([params["wq"], params["wk"], params["wv"]], axis=1)
    b_qkv = jnp.concatenate([params["bq"], params["bk"], params["bv"]])
    qkv = linear(h1, w_qkv, b_qkv, compute_dtype=compute_dtype)       # (M, 3D) fused proj
    q = qkv[:, :d].reshape(b, s, d)
    k = qkv[:, d:2 * d].reshape(b, s, d)
    v = qkv[:, 2 * d:].reshape(b, s, d)
    attn = multi_head_attention_core(q, k, v, mask_i8, num_heads,
                                     compute_dtype=compute_dtype)      # (B, S, D)
    # output projection with the residual add fused into the matmul epilogue.
    y1 = linear(attn.reshape(b * s, d), params["wo"], params["bo"],
                residual=x2d, compute_dtype=compute_dtype)             # (M, D)

    # ---- sublayer 2: y1 + FFN(LN2(y1)) ---------------------------------------
    h2 = layernorm(y1, params["ln2_alpha"], params["ln2_beta"], epsilon=epsilon)
    f1 = linear(h2, params["w1"], params["b1"], activation="relu",
                compute_dtype=compute_dtype)                           # (M, d_ff)
    y2 = linear(f1, params["w2"], params["b2"], residual=y1,
                compute_dtype=compute_dtype)                           # (M, D)
    return y2.reshape(b, s, d)


# -------------------------------- reference -----------------------------------
def reference_encoder_block(params, x, mask, num_heads, epsilon=1e-6):
    b, s, d = x.shape
    dk = d // num_heads

    def ln(t, a, bta):
        mean = t.mean(axis=-1, keepdims=True)
        std = jnp.std(t, axis=-1, keepdims=True, ddof=1)   # torch std: unbiased
        return a * ((t - mean) / (std + epsilon)) + bta

    def lin(t, w, bias):
        return t @ w + bias

    def split(t):
        return t.reshape(b, s, num_heads, dk).transpose(0, 2, 1, 3)

    h = ln(x, params["ln1_alpha"], params["ln1_beta"])
    q = split(lin(h, params["wq"], params["bq"]))
    k = split(lin(h, params["wk"], params["bk"]))
    v = split(lin(h, params["wv"], params["bv"]))
    scores = (q @ jnp.swapaxes(k, -2, -1)) / math.sqrt(dk)
    valid = (mask != 0)[:, None, :, :]
    scores = jnp.where(valid, scores, -1e9)
    p = jax.nn.softmax(scores, axis=-1)
    attn = (p @ v).transpose(0, 2, 1, 3).reshape(b, s, d)
    y1 = x + lin(attn, params["wo"], params["bo"])

    h2 = ln(y1, params["ln2_alpha"], params["ln2_beta"])
    ff = jnp.maximum(lin(h2, params["w1"], params["b1"]), 0.0)
    return y1 + lin(ff, params["w2"], params["b2"])


if __name__ == "__main__":
    B, S, D, H, D_FF = 2, 8, 32, 4, 64
    root = jax.random.PRNGKey(0)
    kp, kx = jax.random.split(root)

    params = init_params(kp, D, D_FF)
    x = jax.random.normal(kx, (B, S, D), jnp.float32)
    # causal mask: 1 = attend, 0 = masked out
    mask = jnp.tril(jnp.ones((S, S), jnp.float32))[None].repeat(B, axis=0)

    fwd = jax.jit(functools.partial(encoder_block, num_heads=H))
    out = jax.block_until_ready(fwd(params, x, mask))

    ref = reference_encoder_block(params, x, mask, H)
    assert out.shape == (B, S, D)
    # tolerance covers pl.reciprocal(approx=True) in the softmax denominator
    assert jnp.allclose(out, ref, atol=1e-2, rtol=1e-2), "mismatch vs reference"

    print("KERNEL_OK")
</pallas_src>

<mosaic_0001>
module attributes {stable_mosaic.version = 11 : i64} {
  func.func @_layernorm_kernel(%arg0: i32, %arg1: memref<16x32xf32, #tpu.memory_space<vmem>>, %arg2: memref<2xf32, #tpu.memory_space<smem>>, %arg3: memref<16x32xf32, #tpu.memory_space<vmem>>) attributes {dimension_semantics = [#tpu.dimension_semantics<parallel>], iteration_bounds = array<i64: 1>, scalar_prefetch = 0 : i64, scratch_operands = 0 : i64, tpu.core_type = #tpu.core_type<tc>, window_params = [{transform_indices = @transform_0, window_bounds = array<i64: 16, 32>}, {transform_indices = @transform_1, window_bounds = array<i64: 2>}, {transform_indices = @transform_2, window_bounds = array<i64: 16, 32>}]} {
    %c0 = arith.constant 0 : index
    %c0_0 = arith.constant 0 : index
    %0 = vector.load %arg1[%c0, %c0_0] : memref<16x32xf32, #tpu.memory_space<vmem>>, vector<16x32xf32>
    %cst = arith.constant dense<0.000000e+00> : vector<16xf32>
    %1 = vector.multi_reduction <add>, %0, %cst [1] : vector<16x32xf32> to vector<16xf32>
    %2 = vector.shape_cast %1 : vector<16xf32> to vector<16x1xf32>
    %cst_1 = arith.constant 3.200000e+01 : f32
    %3 = vector.broadcast %cst_1 : f32 to vector<16x1xf32>
    %4 = arith.divf %2, %3 : vector<16x1xf32>
    %5 = vector.broadcast %4 : vector<16x1xf32> to vector<16x32xf32>
    %6 = arith.subf %0, %5 : vector<16x32xf32>
    %7 = arith.mulf %6, %6 : vector<16x32xf32>
    %cst_2 = arith.constant dense<0.000000e+00> : vector<16xf32>
    %8 = vector.multi_reduction <add>, %7, %cst_2 [1] : vector<16x32xf32> to vector<16xf32>
    %9 = vector.shape_cast %8 : vector<16xf32> to vector<16x1xf32>
    %cst_3 = arith.constant 0.0322580636 : f32
    %10 = vector.broadcast %cst_3 : f32 to vector<16x1xf32>
    %11 = arith.mulf %9, %10 : vector<16x1xf32>
    %12 = math.sqrt %11 : vector<16x1xf32>
    %cst_4 = arith.constant 9.99999997E-7 : f32
    %13 = vector.broadcast %cst_4 : f32 to vector<16x1xf32>
    %14 = arith.addf %12, %13 : vector<16x1xf32>
    %15 = vector.broadcast %14 : vector<16x1xf32> to vector<16x32xf32>
    %16 = arith.divf %6, %15 : vector<16x32xf32>
    %c0_5 = arith.constant 0 : index
    %17 = memref.load %arg2[%c0_5] : memref<2xf32, #tpu.memory_space<smem>>
    %18 = vector.broadcast %17 : f32 to vector<16x32xf32>
    %19 = arith.mulf %18, %16 : vector<16x32xf32>
    %c1 = arith.constant 1 : index
    %20 = memref.load %arg2[%c1] : memref<2xf32, #tpu.memory_space<smem>>
    %21 = vector.broadcast %20 : f32 to vector<16x32xf32>
    %22 = arith.addf %19, %21 : vector<16x32xf32>
    %c0_6 = arith.constant 0 : index
    %c0_7 = arith.constant 0 : index
    %23 = vector.load %arg3[%c0_6, %c0_7] : memref<16x32xf32, #tpu.memory_space<vmem>>, vector<16x32xf32>
    tpu.vector_store %arg3[%c0_6, %c0_7], %22 {strides = array<i32>} : memref<16x32xf32, #tpu.memory_space<vmem>>, vector<16x32xf32>,
    return
  }
  func.func @transform_0(%arg0: i32) -> (i32, i32) {
    %c0_i32 = arith.constant 0 : i32
    %c0_i32_0 = arith.constant 0 : i32
    return %arg0, %c0_i32 : i32, i32
  }
  func.func @transform_1(%arg0: i32) -> i32 {
    %c0_i32 = arith.constant 0 : i32
    %c0_i32_0 = arith.constant 0 : i32
    return %c0_i32 : i32
  }
  func.func @transform_2(%arg0: i32) -> (i32, i32) {
    %c0_i32 = arith.constant 0 : i32
    %c0_i32_0 = arith.constant 0 : i32
    return %arg0, %c0_i32 : i32, i32
  }
}

module attributes {stable_mosaic.version = 11 : i64} {
  func.func @_linear_kernel(%arg0: i32, %arg1: i32, %arg2: i32, %arg3: memref<16x32xf32, #tpu.memory_space<vmem>>, %arg4: memref<32x96xf32, #tpu.memory_space<vmem>>, %arg5: memref<1x96xf32, #tpu.memory_space<vmem>>, %arg6: memref<16x96xf32, #tpu.memory_space<vmem>>, %arg7: memref<16x96xf32, #tpu.memory_space<vmem>>) attributes {dimension_semantics = [#tpu.dimension_semantics<parallel>, #tpu.dimension_semantics<parallel>, #tpu.dimension_semantics<arbitrary>], iteration_bounds = array<i64: 1, 1, 1>, scalar_prefetch = 0 : i64, scratch_operands = 1 : i64, tpu.core_type = #tpu.core_type<tc>, window_params = [{transform_indices = @transform_0, window_bounds = array<i64: 16, 32>}, {transform_indices = @transform_1, window_bounds = array<i64: 32, 96>}, {transform_indices = @transform_2, window_bounds = array<i64: 1, 96>}, {transform_indices = @transform_3, window_bounds = array<i64: 16, 96>}]} {
    %c0_i32 = arith.constant 0 : i32
    %0 = arith.cmpi eq, %arg2, %c0_i32 : i32
    %1 = arith.extui %0 : i1 to i32
    %c0_i32_0 = arith.constant 0 : i32
    %2 = arith.cmpi ne, %1, %c0_i32_0 : i32
    scf.if %2 {
      %cst_10 = arith.constant 0.000000e+00 : f32
      %12 = vector.broadcast %cst_10 : f32 to vector<16x96xf32>
      %c0_11 = arith.constant 0 : index
      %c0_12 = arith.constant 0 : index
      %13 = vector.load %arg7[%c0_11, %c0_12] : memref<16x96xf32, #tpu.memory_space<vmem>>, vector<16x96xf32>
      tpu.vector_store %arg7[%c0_11, %c0_12], %12 {strides = array<i32>} : memref<16x96xf32, #tpu.memory_space<vmem>>, vector<16x96xf32>,
    } else {
    }
    %c0 = arith.constant 0 : index
    %c0_1 = arith.constant 0 : index
    %3 = vector.load %arg7[%c0, %c0_1] : memref<16x96xf32, #tpu.memory_space<vmem>>, vector<16x96xf32>
    %c0_2 = arith.constant 0 : index
    %c0_3 = arith.constant 0 : index
    %4 = vector.load %arg3[%c0_2, %c0_3] : memref<16x32xf32, #tpu.memory_space<vmem>>, vector<16x32xf32>
    %c0_4 = arith.constant 0 : index
    %c0_5 = arith.constant 0 : index
    %5 = vector.load %arg4[%c0_4, %c0_5] : memref<32x96xf32, #tpu.memory_space<vmem>>, vector<32x96xf32>
    %cst = arith.constant dense<0.000000e+00> : vector<16x96xf32>
    %6 = tpu.matmul %4, %5, %cst {dimension_numbers = #tpu.dot_dimension_numbers<[1], [0], [0], [1], [0, 0, 1, 1], [], []>} : vector<16x32xf32>, vector<32x96xf32>, vector<16x96xf32> -> vector<16x96xf32>
    %7 = arith.addf %3, %6 : vector<16x96xf32>
    %c0_6 = arith.constant 0 : index
    %c0_7 = arith.constant 0 : index
    %8 = vector.load %arg7[%c0_6, %c0_7] : memref<16x96xf32, #tpu.memory_space<vmem>>, vector<16x96xf32>
    tpu.vector_store %arg7[%c0_6, %c0_7], %7 {strides = array<i32>} : memref<16x96xf32, #tpu.memory_space<vmem>>, vector<16x96xf32>,
    %c0_i32_8 = arith.constant 0 : i32
    %9 = arith.cmpi eq, %arg2, %c0_i32_8 : i32
    %10 = arith.extui %9 : i1 to i32
    %c0_i32_9 = arith.constant 0 : i32
    %11 = arith.cmpi ne, %10, %c0_i32_9 : i32
    scf.if %11 {
      %c0_10 = arith.constant 0 : index
      %c0_11 = arith.constant 0 : index
      %12 = vector.load %arg7[%c0_10, %c0_11] : memref<16x96xf32, #tpu.memory_space<vmem>>, vector<16x96xf32>
      %c0_12 = arith.constant 0 : index
      %c0_13 = arith.constant 0 : index
      %13 = vector.load %arg5[%c0_12, %c0_13] : memref<1x96xf32, #tpu.memory_space<vmem>>, vector<1x96xf32>
      %14 = vector.broadcast %13 : vector<1x96xf32> to vector<16x96xf32>
      %15 = arith.addf %12, %14 : vector<16x96xf32>
      %c0_14 = arith.constant 0 : index
      %c0_15 = arith.constant 0 : index
      %16 = vector.load %arg6[%c0_14, %c0_15] : memref<16x96xf32, #tpu.memory_space<vmem>>, vector<16x96xf32>
      tpu.vector_store %arg6[%c0_14, %c0_15], %15 {strides = array<i32>} : memref<16x96xf32, #tpu.memory_space<vmem>>, vector<16x96xf32>,
    } else {
    }
    return
  }
  func.func @transform_0(%arg0: i32, %arg1: i32, %arg2: i32) -> (i32, i32) {
    %c0_i32 = arith.constant 0 : i32
    return %arg0, %arg2 : i32, i32
  }
  func.func @transform_1(%arg0: i32, %arg1: i32, %arg2: i32) -> (i32, i32) {
    %c0_i32 = arith.constant 0 : i32
    return %arg2, %arg1 : i32, i32
  }
  func.func @transform_2(%arg0: i32, %arg1: i32, %arg2: i32) -> (i32, i32) {
    %c0_i32 = arith.constant 0 : i32
    %c0_i32_0 = arith.constant 0 : i32
    return %c0_i32, %arg1 : i32, i32
  }
  func.func @transform_3(%arg0: i32, %arg1: i32, %arg2: i32) -> (i32, i32) {
    %c0_i32 = arith.constant 0 : i32
    return %arg0, %arg1 : i32, i32
  }
}

module attributes {stable_mosaic.version = 11 : i64} {
  func.func @_mha_kernel(%arg0: i32, %arg1: i32, %arg2: i32, %arg3: memref<1x8x32xf32, #tpu.memory_space<vmem>>, %arg4: memref<1x8x32xf32, #tpu.memory_space<vmem>>, %arg5: memref<1x8x32xf32, #tpu.memory_space<vmem>>, %arg6: memref<1x8x8xi8, #tpu.memory_space<vmem>>, %arg7: memref<1x8x32xf32, #tpu.memory_space<vmem>>, %arg8: memref<8x4xf32, #tpu.memory_space<vmem>>, %arg9: memref<8x4xf32, #tpu.memory_space<vmem>>, %arg10: memref<8x32xf32, #tpu.memory_space<vmem>>) attributes {dimension_semantics = [#tpu.dimension_semantics<parallel>, #tpu.dimension_semantics<parallel>, #tpu.dimension_semantics<arbitrary>], iteration_bounds = array<i64: 2, 1, 1>, scalar_prefetch = 0 : i64, scratch_operands = 3 : i64, tpu.core_type = #tpu.core_type<tc>, window_params = [{transform_indices = @transform_0, window_bounds = array<i64: 1, 8, 32>}, {transform_indices = @transform_1, window_bounds = array<i64: 1, 8, 32>}, {transform_indices = @transform_2, window_bounds = array<i64: 1, 8, 32>}, {transform_indices = @transform_3, window_bounds = array<i64: 1, 8, 8>}, {transform_indices = @transform_4, window_bounds = array<i64: 1, 8, 32>}]} {
    %c0_i32 = arith.constant 0 : i32
    %0 = arith.cmpi eq, %arg2, %c0_i32 : i32
    %1 = arith.extui %0 : i1 to i32
    %c0_i32_0 = arith.constant 0 : i32
    %2 = arith.cmpi ne, %1, %c0_i32_0 : i32
    scf.if %2 {
      %cst_79 = arith.constant 0xFF800000 : f32
      %136 = vector.broadcast %cst_79 : f32 to vector<8x4xf32>
      %c0_80 = arith.constant 0 : index
      %c0_81 = arith.constant 0 : index
      %137 = vector.load %arg8[%c0_80, %c0_81] : memref<8x4xf32, #tpu.memory_space<vmem>>, vector<8x4xf32>
      tpu.vector_store %arg8[%c0_80, %c0_81], %136 {strides = array<i32>} : memref<8x4xf32, #tpu.memory_space<vmem>>, vector<8x4xf32>,
      %cst_82 = arith.constant 0.000000e+00 : f32
      %138 = vector.broadcast %cst_82 : f32 to vector<8x4xf32>
      %c0_83 = arith.constant 0 : index
      %c0_84 = arith.constant 0 : index
      %139 = vector.load %arg9[%c0_83, %c0_84] : memref<8x4xf32, #tpu.memory_space<vmem>>, vector<8x4xf32>
      tpu.vector_store %arg9[%c0_83, %c0_84], %138 {strides = array<i32>} : memref<8x4xf32, #tpu.memory_space<vmem>>, vector<8x4xf32>,
      %cst_85 = arith.constant 0.000000e+00 : f32
      %140 = vector.broadcast %cst_85 : f32 to vector<8x32xf32>
      %c0_86 = arith.constant 0 : index
      %c0_87 = arith.constant 0 : index
      %141 = vector.load %arg10[%c0_86, %c0_87] : memref<8x32xf32, #tpu.memory_space<vmem>>, vector<8x32xf32>
      tpu.vector_store %arg10[%c0_86, %c0_87], %140 {strides = array<i32>} : memref<8x32xf32, #tpu.memory_space<vmem>>, vector<8x32xf32>,
    } else {
    }
    %c0 = arith.constant 0 : index
    %c0_1 = arith.constant 0 : index
    %c0_2 = arith.constant 0 : index
    %3 = vector.load %arg3[%c0, %c0_1, %c0_2] : memref<1x8x32xf32, #tpu.memory_space<vmem>>, vector<1x8x32xf32>
    %4 = vector.shape_cast %3 : vector<1x8x32xf32> to vector<8x32xf32>
    %c0_3 = arith.constant 0 : index
    %c0_4 = arith.constant 0 : index
    %c0_5 = arith.constant 0 : index
    %5 = vector.load %arg4[%c0_3, %c0_4, %c0_5] : memref<1x8x32xf32, #tpu.memory_space<vmem>>, vector<1x8x32xf32>
    %6 = vector.shape_cast %5 : vector<1x8x32xf32> to vector<8x32xf32>
    %c0_6 = arith.constant 0 : index
    %c0_7 = arith.constant 0 : index
    %c0_8 = arith.constant 0 : index
    %7 = vector.load %arg5[%c0_6, %c0_7, %c0_8] : memref<1x8x32xf32, #tpu.memory_space<vmem>>, vector<1x8x32xf32>
    %8 = vector.shape_cast %7 : vector<1x8x32xf32> to vector<8x32xf32>
    %c0_9 = arith.constant 0 : index
    %c0_10 = arith.constant 0 : index
    %c0_11 = arith.constant 0 : index
    %9 = vector.load %arg6[%c0_9, %c0_10, %c0_11] : memref<1x8x8xi8, #tpu.memory_space<vmem>>, vector<1x8x8xi8>
    %10 = vector.shape_cast %9 : vector<1x8x8xi8> to vector<8x8xi8>
    %c0_i8 = arith.constant 0 : i8
    %11 = vector.broadcast %c0_i8 : i8 to vector<8x8xi8>
    %12 = arith.cmpi ne, %10, %11 : vector<8x8xi8>
    %13 = vector.extract_strided_slice %4 {offsets = [0, 0], sizes = [8, 8], strides = [1, 1]} : vector<8x32xf32> to vector<8x8xf32>
    %14 = vector.extract_strided_slice %6 {offsets = [0, 0], sizes = [8, 8], strides = [1, 1]} : vector<8x32xf32> to vector<8x8xf32>
    %cst = arith.constant dense<0.000000e+00> : vector<8x8xf32>
    %15 = tpu.matmul %13, %14, %cst {dimension_numbers = #tpu.dot_dimension_numbers<[1], [1], [0], [0], [0, 0, 1, 0], [], []>} : vector<8x8xf32>, vector<8x8xf32>, vector<8x8xf32> -> vector<8x8xf32>
    %cst_12 = arith.constant 0.353553385 : f32
    %16 = vector.broadcast %cst_12 : f32 to vector<8x8xf32>
    %17 = arith.mulf %15, %16 : vector<8x8xf32>
    %cst_13 = arith.constant -1.000000e+09 : f32
    %18 = vector.broadcast %cst_13 : f32 to vector<8x8xf32>
    %19 = arith.select %12, %17, %18 : vector<8x8xi1>, vector<8x8xf32>
    %c0_14 = arith.constant 0 : index
    %c0_15 = arith.constant 0 : index
    %20 = vector.load %arg8[%c0_14, %c0_15] : memref<8x4xf32, #tpu.memory_space<vmem>>, vector<8x1xf32>
    %cst_16 = arith.constant dense<0xFF800000> : vector<8xf32>
    %21 = vector.multi_reduction <maximumf>, %19, %cst_16 [1] : vector<8x8xf32> to vector<8xf32>
    %22 = vector.shape_cast %21 : vector<8xf32> to vector<8x1xf32>
    %23 = arith.maximumf %20, %22 : vector<8x1xf32>
    %24 = arith.subf %20, %23 : vector<8x1xf32>
    %25 = math.exp %24 : vector<8x1xf32>
    %26 = vector.broadcast %23 : vector<8x1xf32> to vector<8x8xf32>
    %27 = arith.subf %19, %26 : vector<8x8xf32>
    %28 = math.exp %27 : vector<8x8xf32>
    %c0_17 = arith.constant 0 : index
    %c0_18 = arith.constant 0 : index
    %29 = vector.load %arg9[%c0_17, %c0_18] : memref<8x4xf32, #tpu.memory_space<vmem>>, vector<8x1xf32>
    %30 = arith.mulf %25, %29 : vector<8x1xf32>
    %cst_19 = arith.constant dense<0.000000e+00> : vector<8xf32>
    %31 = vector.multi_reduction <add>, %28, %cst_19 [1] : vector<8x8xf32> to vector<8xf32>
    %32 = vector.shape_cast %31 : vector<8xf32> to vector<8x1xf32>
    %33 = arith.addf %30, %32 : vector<8x1xf32>
    %c0_20 = arith.constant 0 : index
    %c0_21 = arith.constant 0 : index
    %34 = vector.load %arg9[%c0_20, %c0_21] : memref<8x4xf32, #tpu.memory_space<vmem>>, vector<8x1xf32>
    tpu.vector_store %arg9[%c0_20, %c0_21], %33 {strides = array<i32>} : memref<8x4xf32, #tpu.memory_space<vmem>>, vector<8x1xf32>,
    %c0_22 = arith.constant 0 : index
    %c0_23 = arith.constant 0 : index
    %35 = vector.load %arg10[%c0_22, %c0_23] : memref<8x32xf32, #tpu.memory_space<vmem>>, vector<8x8xf32>
    %36 = vector.broadcast %25 : vector<8x1xf32> to vector<8x8xf32>
    %37 = arith.mulf %36, %35 : vector<8x8xf32>
    %38 = vector.extract_strided_slice %8 {offsets = [0, 0], sizes = [8, 8], strides = [1, 1]} : vector<8x32xf32> to vector<8x8xf32>
    %cst_24 = arith.constant dense<0.000000e+00> : vector<8x8xf32>
    %39 = tpu.matmul %28, %38, %cst_24 {dimension_numbers = #tpu.dot_dimension_numbers<[1], [0], [0], [1], [0, 0, 1, 1], [], []>} : vector<8x8xf32>, vector<8x8xf32>, vector<8x8xf32> -> vector<8x8xf32>
    %40 = arith.addf %37, %39 : vector<8x8xf32>
    %c0_25 = arith.constant 0 : index
    %c0_26 = arith.constant 0 : index
    %41 = vector.load %arg10[%c0_25, %c0_26] : memref<8x32xf32, #tpu.memory_space<vmem>>, vector<8x8xf32>
    tpu.vector_store %arg10[%c0_25, %c0_26], %40 {strides = array<i32>} : memref<8x32xf32, #tpu.memory_space<vmem>>, vector<8x8xf32>,
    %c0_27 = arith.constant 0 : index
    %c0_28 = arith.constant 0 : index
    %42 = vector.load %arg8[%c0_27, %c0_28] : memref<8x4xf32, #tpu.memory_space<vmem>>, vector<8x1xf32>
    tpu.vector_store %arg8[%c0_27, %c0_28], %23 {strides = array<i32>} : memref<8x4xf32, #tpu.memory_space<vmem>>, vector<8x1xf32>,
    %43 = vector.extract_strided_slice %4 {offsets = [0, 8], sizes = [8, 8], strides = [1, 1]} : vector<8x32xf32> to vector<8x8xf32>
    %44 = vector.extract_strided_slice %6 {offsets = [0, 8], sizes = [8, 8], strides = [1, 1]} : vector<8x32xf32> to vector<8x8xf32>
    %cst_29 = arith.constant dense<0.000000e+00> : vector<8x8xf32>
    %45 = tpu.matmul %43, %44, %cst_29 {dimension_numbers = #tpu.dot_dimension_numbers<[1], [1], [0], [0], [0, 0, 1, 0], [], []>} : vector<8x8xf32>, vector<8x8xf32>, vector<8x8xf32> -> vector<8x8xf32>
    %cst_30 = arith.constant 0.353553385 : f32
    %46 = vector.broadcast %cst_30 : f32 to vector<8x8xf32>
    %47 = arith.mulf %45, %46 : vector<8x8xf32>
    %cst_31 = arith.constant -1.000000e+09 : f32
    %48 = vector.broadcast %cst_31 : f32 to vector<8x8xf32>
    %49 = arith.select %12, %47, %48 : vector<8x8xi1>, vector<8x8xf32>
    %c0_32 = arith.constant 0 : index
    %c1 = arith.constant 1 : index
    %50 = vector.load %arg8[%c0_32, %c1] : memref<8x4xf32, #tpu.memory_space<vmem>>, vector<8x1xf32>
    %cst_33 = arith.constant dense<0xFF800000> : vector<8xf32>
    %51 = vector.multi_reduction <maximumf>, %49, %cst_33 [1] : vector<8x8xf32> to vector<8xf32>
    %52 = vector.shape_cast %51 : vector<8xf32> to vector<8x1xf32>
    %53 = arith.maximumf %50, %52 : vector<8x1xf32>
    %54 = arith.subf %50, %53 : vector<8x1xf32>
    %55 = math.exp %54 : vector<8x1xf32>
    %56 = vector.broadcast %53 : vector<8x1xf32> to vector<8x8xf32>
    %57 = arith.subf %49, %56 : vector<8x8xf32>
    %58 = math.exp %57 : vector<8x8xf32>
    %c0_34 = arith.constant 0 : index
    %c1_35 = arith.constant 1 : index
    %59 = vector.load %arg9[%c0_34, %c1_35] : memref<8x4xf32, #tpu.memory_space<vmem>>, vector<8x1xf32>
    %60 = arith.mulf %55, %59 : vector<8x1xf32>
    %cst_36 = arith.constant dense<0.000000e+00> : vector<8xf32>
    %61 = vector.multi_reduction <add>, %58, %cst_36 [1] : vector<8x8xf32> to vector<8xf32>
    %62 = vector.shape_cast %61 : vector<8xf32> to vector<8x1xf32>
    %63 = arith.addf %60, %62 : vector<8x1xf32>
    %c0_37 = arith.constant 0 : index
    %c1_38 = arith.constant 1 : index
    %64 = vector.load %arg9[%c0_37, %c1_38] : memref<8x4xf32, #tpu.memory_space<vmem>>, vector<8x1xf32>
    tpu.vector_store %arg9[%c0_37, %c1_38], %63 {strides = array<i32>} : memref<8x4xf32, #tpu.memory_space<vmem>>, vector<8x1xf32>,
    %c0_39 = arith.constant 0 : index
    %c8 = arith.constant 8 : index
    %65 = vector.load %arg10[%c0_39, %c8] : memref<8x32xf32, #tpu.memory_space<vmem>>, vector<8x8xf32>
    %66 = vector.broadcast %55 : vector<8x1xf32> to vector<8x8xf32>
    %67 = arith.mulf %66, %65 : vector<8x8xf32>
    %68 = vector.extract_strided_slice %8 {offsets = [0, 8], sizes = [8, 8], strides = [1, 1]} : vector<8x32xf32> to vector<8x8xf32>
    %cst_40 = arith.constant dense<0.000000e+00> : vector<8x8xf32>
    %69 = tpu.matmul %58, %68, %cst_40 {dimension_numbers = #tpu.dot_dimension_numbers<[1], [0], [0], [1], [0, 0, 1, 1], [], []>} : vector<8x8xf32>, vector<8x8xf32>, vector<8x8xf32> -> vector<8x8xf32>
    %70 = arith.addf %67, %69 : vector<8x8xf32>
    %c0_41 = arith.constant 0 : index
    %c8_42 = arith.constant 8 : index
    %71 = vector.load %arg10[%c0_41, %c8_42] : memref<8x32xf32, #tpu.memory_space<vmem>>, vector<8x8xf32>
    tpu.vector_store %arg10[%c0_41, %c8_42], %70 {strides = array<i32>} : memref<8x32xf32, #tpu.memory_space<vmem>>, vector<8x8xf32>,
    %c0_43 = arith.constant 0 : index
    %c1_44 = arith.constant 1 : index
    %72 = vector.load %arg8[%c0_43, %c1_44] : memref<8x4xf32, #tpu.memory_space<vmem>>, vector<8x1xf32>
    tpu.vector_store %arg8[%c0_43, %c1_44], %53 {strides = array<i32>} : memref<8x4xf32, #tpu.memory_space<vmem>>, vector<8x1xf32>,
    %73 = vector.extract_strided_slice %4 {offsets = [0, 16], sizes = [8, 8], strides = [1, 1]} : vector<8x32xf32> to vector<8x8xf32>
    %74 = vector.extract_strided_slice %6 {offsets = [0, 16], sizes = [8, 8], strides = [1, 1]} : vector<8x32xf32> to vector<8x8xf32>
    %cst_45 = arith.constant dense<0.000000e+00> : vector<8x8xf32>
    %75 = tpu.matmul %73, %74, %cst_45 {dimension_numbers = #tpu.dot_dimension_numbers<[1], [1], [0], [0], [0, 0, 1, 0], [], []>} : vector<8x8xf32>, vector<8x8xf32>, vector<8x8xf32> -> vector<8x8xf32>
    %cst_46 = arith.constant 0.353553385 : f32
    %76 = vector.broadcast %cst_46 : f32 to vector<8x8xf32>
    %77 = arith.mulf %75, %76 : vector<8x8xf32>
    %cst_47 = arith.constant -1.000000e+09 : f32
    %78 = vector.broadcast %cst_47 : f32 to vector<8x8xf32>
    %79 = arith.select %12, %77, %78 : vector<8x8xi1>, vector<8x8xf32>
    %c0_48 = arith.constant 0 : index
    %c2 = arith.constant 2 : index
    %80 = vector.load %arg8[%c0_48, %c2] : memref<8x4xf32, #tpu.memory_space<vmem>>, vector<8x1xf32>
    %cst_49 = arith.constant dense<0xFF800000> : vector<8xf32>
    %81 = vector.multi_reduction <maximumf>, %79, %cst_49 [1] : vector<8x8xf32> to vector<8xf32>
    %82 = vector.shape_cast %81 : vector<8xf32> to vector<8x1xf32>
    %83 = arith.maximumf %80, %82 : vector<8x1xf32>
    %84 = arith.subf %80, %83 : vector<8x1xf32>
    %85 = math.exp %84 : vector<8x1xf32>
    %86 = vector.broadcast %83 : vector<8x1xf32> to vector<8x8xf32>
    %87 = arith.subf %79, %86 : vector<8x8xf32>
    %88 = math.exp %87 : vector<8x8xf32>
    %c0_50 = arith.constant 0 : index
    %c2_51 = arith.constant 2 : index
    %89 = vector.load %arg9[%c0_50, %c2_51] : memref<8x4xf32, #tpu.memory_space<vmem>>, vector<8x1xf32>
    %90 = arith.mulf %85, %89 : vector<8x1xf32>
    %cst_52 = arith.constant dense<0.000000e+00> : vector<8xf32>
    %91 = vector.multi_reduction <add>, %88, %cst_52 [1] : vector<8x8xf32> to vector<8xf32>
    %92 = vector.shape_cast %91 : vector<8xf32> to vector<8x1xf32>
    %93 = arith.addf %90, %92 : vector<8x1xf32>
    %c0_53 = arith.constant 0 : index
    %c2_54 = arith.constant 2 : index
    %94 = vector.load %arg9[%c0_53, %c2_54] : memref<8x4xf32, #tpu.memory_space<vmem>>, vector<8x1xf32>
    tpu.vector_store %arg9[%c0_53, %c2_54], %93 {strides = array<i32>} : memref<8x4xf32, #tpu.memory_space<vmem>>, vector<8x1xf32>,
    %c0_55 = arith.constant 0 : index
    %c16 = arith.constant 16 : index
    %95 = vector.load %arg10[%c0_55, %c16] : memref<8x32xf32, #tpu.memory_space<vmem>>, vector<8x8xf32>
    %96 = vector.broadcast %85 : vector<8x1xf32> to vector<8x8xf32>
    %97 = arith.mulf %96, %95 : vector<8x8xf32>
    %98 = vector.extract_strided_slice %8 {offsets = [0, 16], sizes = [8, 8], strides = [1, 1]} : vector<8x32xf32> to vector<8x8xf32>
    %cst_56 = arith.constant dense<0.000000e+00> : vector<8x8xf32>
    %99 = tpu.matmul %88, %98, %cst_56 {dimension_numbers = #tpu.dot_dimension_numbers<[1], [0], [0], [1], [0, 0, 1, 1], [], []>} : vector<8x8xf32>, vector<8x8xf32>, vector<8x8xf32> -> vector<8x8xf32>
    %100 = arith.addf %97, %99 : vector<8x8xf32>
    %c0_57 = arith.constant 0 : index
    %c16_58 = arith.constant 16 : index
    %101 = vector.load %arg10[%c0_57, %c16_58] : memref<8x32xf32, #tpu.memory_space<vmem>>, vector<8x8xf32>
    tpu.vector_store %arg10[%c0_57, %c16_58], %100 {strides = array<i32>} : memref<8x32xf32, #tpu.memory_space<vmem>>, vector<8x8xf32>,
    %c0_59 = arith.constant 0 : index
    %c2_60 = arith.constant 2 : index
    %102 = vector.load %arg8[%c0_59, %c2_60] : memref<8x4xf32, #tpu.memory_space<vmem>>, vector<8x1xf32>
    tpu.vector_store %arg8[%c0_59, %c2_60], %83 {strides = array<i32>} : memref<8x4xf32, #tpu.memory_space<vmem>>, vector<8x1xf32>,
    %103 = vector.extract_strided_slice %4 {offsets = [0, 24], sizes = [8, 8], strides = [1, 1]} : vector<8x32xf32> to vector<8x8xf32>
    %104 = vector.extract_strided_slice %6 {offsets = [0, 24], sizes = [8, 8], strides = [1, 1]} : vector<8x32xf32> to vector<8x8xf32>
    %cst_61 = arith.constant dense<0.000000e+00> : vector<8x8xf32>
    %105 = tpu.matmul %103, %104, %cst_61 {dimension_numbers = #tpu.dot_dimension_numbers<[1], [1], [0], [0], [0, 0, 1, 0], [], []>} : vector<8x8xf32>, vector<8x8xf32>, vector<8x8xf32> -> vector<8x8xf32>
    %cst_62 = arith.constant 0.353553385 : f32
    %106 = vector.broadcast %cst_62 : f32 to vector<8x8xf32>
    %107 = arith.mulf %105, %106 : vector<8x8xf32>
    %cst_63 = arith.constant -1.000000e+09 : f32
    %108 = vector.broadcast %cst_63 : f32 to vector<8x8xf32>
    %109 = arith.select %12, %107, %108 : vector<8x8xi1>, vector<8x8xf32>
    %c0_64 = arith.constant 0 : index
    %c3 = arith.constant 3 : index
    %110 = vector.load %arg8[%c0_64, %c3] : memref<8x4xf32, #tpu.memory_space<vmem>>, vector<8x1xf32>
    %cst_65 = arith.constant dense<0xFF800000> : vector<8xf32>
    %111 = vector.multi_reduction <maximumf>, %109, %cst_65 [1] : vector<8x8xf32> to vector<8xf32>
    %112 = vector.shape_cast %111 : vector<8xf32> to vector<8x1xf32>
    %113 = arith.maximumf %110, %112 : vector<8x1xf32>
    %114 = arith.subf %110, %113 : vector<8x1xf32>
    %115 = math.exp %114 : vector<8x1xf32>
    %116 = vector.broadcast %113 : vector<8x1xf32> to vector<8x8xf32>
    %117 = arith.subf %109, %116 : vector<8x8xf32>
    %118 = math.exp %117 : vector<8x8xf32>
    %c0_66 = arith.constant 0 : index
    %c3_67 = arith.constant 3 : index
    %119 = vector.load %arg9[%c0_66, %c3_67] : memref<8x4xf32, #tpu.memory_space<vmem>>, vector<8x1xf32>
    %120 = arith.mulf %115, %119 : vector<8x1xf32>
    %cst_68 = arith.constant dense<0.000000e+00> : vector<8xf32>
    %121 = vector.multi_reduction <add>, %118, %cst_68 [1] : vector<8x8xf32> to vector<8xf32>
    %122 = vector.shape_cast %121 : vector<8xf32> to vector<8x1xf32>
    %123 = arith.addf %120, %122 : vector<8x1xf32>
    %c0_69 = arith.constant 0 : index
    %c3_70 = arith.constant 3 : index
    %124 = vector.load %arg9[%c0_69, %c3_70] : memref<8x4xf32, #tpu.memory_space<vmem>>, vector<8x1xf32>
    tpu.vector_store %arg9[%c0_69, %c3_70], %123 {strides = array<i32>} : memref<8x4xf32, #tpu.memory_space<vmem>>, vector<8x1xf32>,
    %c0_71 = arith.constant 0 : index
    %c24 = arith.constant 24 : index
    %125 = vector.load %arg10[%c0_71, %c24] : memref<8x32xf32, #tpu.memory_space<vmem>>, vector<8x8xf32>
    %126 = vector.broadcast %115 : vector<8x1xf32> to vector<8x8xf32>
    %127 = arith.mulf %126, %125 : vector<8x8xf32>
    %128 = vector.extract_strided_slice %8 {offsets = [0, 24], sizes = [8, 8], strides = [1, 1]} : vector<8x32xf32> to vector<8x8xf32>
    %cst_72 = arith.constant dense<0.000000e+00> : vector<8x8xf32>
    %129 = tpu.matmul %118, %128, %cst_72 {dimension_numbers = #tpu.dot_dimension_numbers<[1], [0], [0], [1], [0, 0, 1, 1], [], []>} : vector<8x8xf32>, vector<8x8xf32>, vector<8x8xf32> -> vector<8x8xf32>
    %130 = arith.addf %127, %129 : vector<8x8xf32>
    %c0_73 = arith.constant 0 : index
    %c24_74 = arith.constant 24 : index
    %131 = vector.load %arg10[%c0_73, %c24_74] : memref<8x32xf32, #tpu.memory_space<vmem>>, vector<8x8xf32>
    tpu.vector_store %arg10[%c0_73, %c24_74], %130 {strides = array<i32>} : memref<8x32xf32, #tpu.memory_space<vmem>>, vector<8x8xf32>,
    %c0_75 = arith.constant 0 : index
    %c3_76 = arith.constant 3 : index
    %132 = vector.load %arg8[%c0_75, %c3_76] : memref<8x4xf32, #tpu.memory_space<vmem>>, vector<8x1xf32>
    tpu.vector_store %arg8[%c0_75, %c3_76], %113 {strides = array<i32>} : memref<8x4xf32, #tpu.memory_space<vmem>>, vector<8x1xf32>,
    %c0_i32_77 = arith.constant 0 : i32
    %133 = arith.cmpi eq, %arg2, %c0_i32_77 : i32
    %134 = arith.extui %133 : i1 to i32
    %c0_i32_78 = arith.constant 0 : i32
    %135 = arith.cmpi ne, %134, %c0_i32_78 : i32
    scf.if %135 {
      %c0_79 = arith.constant 0 : index
      %c0_80 = arith.constant 0 : index
      %136 = vector.load %arg9[%c0_79, %c0_80] : memref<8x4xf32, #tpu.memory_space<vmem>>, vector<8x4xf32>
      %137 = tpu.reciprocal %136 {approx = true} : vector<8x4xf32> -> vector<8x4xf32>
      %c0_81 = arith.constant 0 : index
      %c0_82 = arith.constant 0 : index
      %138 = vector.load %arg10[%c0_81, %c0_82] : memref<8x32xf32, #tpu.memory_space<vmem>>, vector<8x8xf32>
      %139 = vector.extract_strided_slice %137 {offsets = [0, 0], sizes = [8, 1], strides = [1, 1]} : vector<8x4xf32> to vector<8x1xf32>
      %140 = vector.broadcast %139 : vector<8x1xf32> to vector<8x8xf32>
      %141 = arith.mulf %138, %140 : vector<8x8xf32>
      %c0_83 = arith.constant 0 : index
      %c8_84 = arith.constant 8 : index
      %142 = vector.load %arg10[%c0_83, %c8_84] : memref<8x32xf32, #tpu.memory_space<vmem>>, vector<8x8xf32>
      %143 = vector.extract_strided_slice %137 {offsets = [0, 1], sizes = [8, 1], strides = [1, 1]} : vector<8x4xf32> to vector<8x1xf32>
      %144 = vector.broadcast %143 : vector<8x1xf32> to vector<8x8xf32>
      %145 = arith.mulf %142, %144 : vector<8x8xf32>
      %c0_85 = arith.constant 0 : index
      %c16_86 = arith.constant 16 : index
      %146 = vector.load %arg10[%c0_85, %c16_86] : memref<8x32xf32, #tpu.memory_space<vmem>>, vector<8x8xf32>
      %147 = vector.extract_strided_slice %137 {offsets = [0, 2], sizes = [8, 1], strides = [1, 1]} : vector<8x4xf32> to vector<8x1xf32>
      %148 = vector.broadcast %147 : vector<8x1xf32> to vector<8x8xf32>
      %149 = arith.mulf %146, %148 : vector<8x8xf32>
      %c0_87 = arith.constant 0 : index
      %c24_88 = arith.constant 24 : index
      %150 = vector.load %arg10[%c0_87, %c24_88] : memref<8x32xf32, #tpu.memory_space<vmem>>, vector<8x8xf32>
      %151 = vector.extract_strided_slice %137 {offsets = [0, 3], sizes = [8, 1], strides = [1, 1]} : vector<8x4xf32> to vector<8x1xf32>
      %152 = vector.broadcast %151 : vector<8x1xf32> to vector<8x8xf32>
      %153 = arith.mulf %150, %152 : vector<8x8xf32>
      %154 = tpu.concatenate %141, %145, %149, %153 in 1 : vector<8x8xf32>, vector<8x8xf32>, vector<8x8xf32>, vector<8x8xf32> -> vector<8x32xf32>
      %c0_89 = arith.constant 0 : index
      %c0_90 = arith.constant 0 : index
      %c0_91 = arith.constant 0 : index
      %155 = vector.load %arg7[%c0_89, %c0_90, %c0_91] : memref<1x8x32xf32, #tpu.memory_space<vmem>>, vector<1x8x32xf32>
      %156 = vector.shape_cast %155 : vector<1x8x32xf32> to vector<8x32xf32>
      %157 = vector.shape_cast %154 : vector<8x32xf32> to vector<1x8x32xf32>
      tpu.vector_store %arg7[%c0_89, %c0_90, %c0_91], %157 {strides = array<i32>} : memref<1x8x32xf32, #tpu.memory_space<vmem>>, vector<1x8x32xf32>,
    } else {
    }
    return
  }
  func.func @transform_0(%arg0: i32, %arg1: i32, %arg2: i32) -> (i32, i32, i32) {
    %c0_i32 = arith.constant 0 : i32
    %c0_i32_0 = arith.constant 0 : i32
    return %arg0, %arg1, %c0_i32 : i32, i32, i32
  }
  func.func @transform_1(%arg0: i32, %arg1: i32, %arg2: i32) -> (i32, i32, i32) {
    %c0_i32 = arith.constant 0 : i32
    %c0_i32_0 = arith.constant 0 : i32
    return %arg0, %arg2, %c0_i32 : i32, i32, i32
  }
  func.func @transform_2(%arg0: i32, %arg1: i32, %arg2: i32) -> (i32, i32, i32) {
    %c0_i32 = arith.constant 0 : i32
    %c0_i32_0 = arith.constant 0 : i32
    return %arg0, %arg2, %c0_i32 : i32, i32, i32
  }
  func.func @transform_3(%arg0: i32, %arg1: i32, %arg2: i32) -> (i32, i32, i32) {
    %c0_i32 = arith.constant 0 : i32
    return %arg0, %arg1, %arg2 : i32, i32, i32
  }
  func.func @transform_4(%arg0: i32, %arg1: i32, %arg2: i32) -> (i32, i32, i32) {
    %c0_i32 = arith.constant 0 : i32
    %c0_i32_0 = arith.constant 0 : i32
    return %arg0, %arg1, %c0_i32 : i32, i32, i32
  }
}

module attributes {stable_mosaic.version = 11 : i64} {
  func.func @_linear_kernel(%arg0: i32, %arg1: i32, %arg2: i32, %arg3: memref<16x32xf32, #tpu.memory_space<vmem>>, %arg4: memref<32x32xf32, #tpu.memory_space<vmem>>, %arg5: memref<1x32xf32, #tpu.memory_space<vmem>>, %arg6: memref<16x32xf32, #tpu.memory_space<vmem>>, %arg7: memref<16x32xf32, #tpu.memory_space<vmem>>, %arg8: memref<16x32xf32, #tpu.memory_space<vmem>>) attributes {dimension_semantics = [#tpu.dimension_semantics<parallel>, #tpu.dimension_semantics<parallel>, #tpu.dimension_semantics<arbitrary>], iteration_bounds = array<i64: 1, 1, 1>, scalar_prefetch = 0 : i64, scratch_operands = 1 : i64, tpu.core_type = #tpu.core_type<tc>, window_params = [{transform_indices = @transform_0, window_bounds = array<i64: 16, 32>}, {transform_indices = @transform_1, window_bounds = array<i64: 32, 32>}, {transform_indices = @transform_2, window_bounds = array<i64: 1, 32>}, {transform_indices = @transform_3, window_bounds = array<i64: 16, 32>}, {transform_indices = @transform_4, window_bounds = array<i64: 16, 32>}]} {
    %c0_i32 = arith.constant 0 : i32
    %0 = arith.cmpi eq, %arg2, %c0_i32 : i32
    %1 = arith.extui %0 : i1 to i32
    %c0_i32_0 = arith.constant 0 : i32
    %2 = arith.cmpi ne, %1, %c0_i32_0 : i32
    scf.if %2 {
      %cst_10 = arith.constant 0.000000e+00 : f32
      %12 = vector.broadcast %cst_10 : f32 to vector<16x32xf32>
      %c0_11 = arith.constant 0 : index
      %c0_12 = arith.constant 0 : index
      %13 = vector.load %arg8[%c0_11, %c0_12] : memref<16x32xf32, #tpu.memory_space<vmem>>, vector<16x32xf32>
      tpu.vector_store %arg8[%c0_11, %c0_12], %12 {strides = array<i32>} : memref<16x32xf32, #tpu.memory_space<vmem>>, vector<16x32xf32>,
    } else {
    }
    %c0 = arith.constant 0 : index
    %c0_1 = arith.constant 0 : index
    %3 = vector.load %arg8[%c0, %c0_1] : memref<16x32xf32, #tpu.memory_space<vmem>>, vector<16x32xf32>
    %c0_2 = arith.constant 0 : index
    %c0_3 = arith.constant 0 : index
    %4 = vector.load %arg3[%c0_2, %c0_3] : memref<16x32xf32, #tpu.memory_space<vmem>>, vector<16x32xf32>
    %c0_4 = arith.constant 0 : index
    %c0_5 = arith.constant 0 : index
    %5 = vector.load %arg4[%c0_4, %c0_5] : memref<32x32xf32, #tpu.memory_space<vmem>>, vector<32x32xf32>
    %cst = arith.constant dense<0.000000e+00> : vector<16x32xf32>
    %6 = tpu.matmul %4, %5, %cst {dimension_numbers = #tpu.dot_dimension_numbers<[1], [0], [0], [1], [0, 0, 1, 1], [], []>} : vector<16x32xf32>, vector<32x32xf32>, vector<16x32xf32> -> vector<16x32xf32>
    %7 = arith.addf %3, %6 : vector<16x32xf32>
    %c0_6 = arith.constant 0 : index
    %c0_7 = arith.constant 0 : index
    %8 = vector.load %arg8[%c0_6, %c0_7] : memref<16x32xf32, #tpu.memory_space<vmem>>, vector<16x32xf32>
    tpu.vector_store %arg8[%c0_6, %c0_7], %7 {strides = array<i32>} : memref<16x32xf32, #tpu.memory_space<vmem>>, vector<16x32xf32>,
    %c0_i32_8 = arith.constant 0 : i32
    %9 = arith.cmpi eq, %arg2, %c0_i32_8 : i32
    %10 = arith.extui %9 : i1 to i32
    %c0_i32_9 = arith.constant 0 : i32
    %11 = arith.cmpi ne, %10, %c0_i32_9 : i32
    scf.if %11 {
      %c0_10 = arith.constant 0 : index
      %c0_11 = arith.constant 0 : index
      %12 = vector.load %arg8[%c0_10, %c0_11] : memref<16x32xf32, #tpu.memory_space<vmem>>, vector<16x32xf32>
      %c0_12 = arith.constant 0 : index
      %c0_13 = arith.constant 0 : index
      %13 = vector.load %arg5[%c0_12, %c0_13] : memref<1x32xf32, #tpu.memory_space<vmem>>, vector<1x32xf32>
      %14 = vector.broadcast %13 : vector<1x32xf32> to vector<16x32xf32>
      %15 = arith.addf %12, %14 : vector<16x32xf32>
      %c0_14 = arith.constant 0 : index
      %c0_15 = arith.constant 0 : index
      %16 = vector.load %arg6[%c0_14, %c0_15] : memref<16x32xf32, #tpu.memory_space<vmem>>, vector<16x32xf32>
      %17 = arith.addf %15, %16 : vector<16x32xf32>
      %c0_16 = arith.constant 0 : index
      %c0_17 = arith.constant 0 : index
      %18 = vector.load %arg7[%c0_16, %c0_17] : memref<16x32xf32, #tpu.memory_space<vmem>>, vector<16x32xf32>
      tpu.vector_store %arg7[%c0_16, %c0_17], %17 {strides = array<i32>} : memref<16x32xf32, #tpu.memory_space<vmem>>, vector<16x32xf32>,
    } else {
    }
    return
  }
  func.func @transform_0(%arg0: i32, %arg1: i32, %arg2: i32) -> (i32, i32) {
    %c0_i32 = arith.constant 0 : i32
    return %arg0, %arg2 : i32, i32
  }
  func.func @transform_1(%arg0: i32, %arg1: i32, %arg2: i32) -> (i32, i32) {
    %c0_i32 = arith.constant 0 : i32
    return %arg2, %arg1 : i32, i32
  }
  func.func @transform_2(%arg0: i32, %arg1: i32, %arg2: i32) -> (i32, i32) {
    %c0_i32 = arith.constant 0 : i32
    %c0_i32_0 = arith.constant 0 : i32
    return %c0_i32, %arg1 : i32, i32
  }
  func.func @transform_3(%arg0: i32, %arg1: i32, %arg2: i32) -> (i32, i32) {
    %c0_i32 = arith.constant 0 : i32
    return %arg0, %arg1 : i32, i32
  }
  func.func @transform_4(%arg0: i32, %arg1: i32, %arg2: i32) -> (i32, i32) {
    %c0_i32 = arith.constant 0 : i32
    return %arg0, %arg1 : i32, i32
  }
}

module attributes {stable_mosaic.version = 11 : i64} {
  func.func @_linear_kernel(%arg0: i32, %arg1: i32, %arg2: i32, %arg3: memref<16x32xf32, #tpu.memory_space<vmem>>, %arg4: memref<32x64xf32, #tpu.memory_space<vmem>>, %arg5: memref<1x64xf32, #tpu.memory_space<vmem>>, %arg6: memref<16x64xf32, #tpu.memory_space<vmem>>, %arg7: memref<16x64xf32, #tpu.memory_space<vmem>>) attributes {dimension_semantics = [#tpu.dimension_semantics<parallel>, #tpu.dimension_semantics<parallel>, #tpu.dimension_semantics<arbitrary>], iteration_bounds = array<i64: 1, 1, 1>, scalar_prefetch = 0 : i64, scratch_operands = 1 : i64, tpu.core_type = #tpu.core_type<tc>, window_params = [{transform_indices = @transform_0, window_bounds = array<i64: 16, 32>}, {transform_indices = @transform_1, window_bounds = array<i64: 32, 64>}, {transform_indices = @transform_2, window_bounds = array<i64: 1, 64>}, {transform_indices = @transform_3, window_bounds = array<i64: 16, 64>}]} {
    %c0_i32 = arith.constant 0 : i32
    %0 = arith.cmpi eq, %arg2, %c0_i32 : i32
    %1 = arith.extui %0 : i1 to i32
    %c0_i32_0 = arith.constant 0 : i32
    %2 = arith.cmpi ne, %1, %c0_i32_0 : i32
    scf.if %2 {
      %cst_10 = arith.constant 0.000000e+00 : f32
      %12 = vector.broadcast %cst_10 : f32 to vector<16x64xf32>
      %c0_11 = arith.constant 0 : index
      %c0_12 = arith.constant 0 : index
      %13 = vector.load %arg7[%c0_11, %c0_12] : memref<16x64xf32, #tpu.memory_space<vmem>>, vector<16x64xf32>
      tpu.vector_store %arg7[%c0_11, %c0_12], %12 {strides = array<i32>} : memref<16x64xf32, #tpu.memory_space<vmem>>, vector<16x64xf32>,
    } else {
    }
    %c0 = arith.constant 0 : index
    %c0_1 = arith.constant 0 : index
    %3 = vector.load %arg7[%c0, %c0_1] : memref<16x64xf32, #tpu.memory_space<vmem>>, vector<16x64xf32>
    %c0_2 = arith.constant 0 : index
    %c0_3 = arith.constant 0 : index
    %4 = vector.load %arg3[%c0_2, %c0_3] : memref<16x32xf32, #tpu.memory_space<vmem>>, vector<16x32xf32>
    %c0_4 = arith.constant 0 : index
    %c0_5 = arith.constant 0 : index
    %5 = vector.load %arg4[%c0_4, %c0_5] : memref<32x64xf32, #tpu.memory_space<vmem>>, vector<32x64xf32>
    %cst = arith.constant dense<0.000000e+00> : vector<16x64xf32>
    %6 = tpu.matmul %4, %5, %cst {dimension_numbers = #tpu.dot_dimension_numbers<[1], [0], [0], [1], [0, 0, 1, 1], [], []>} : vector<16x32xf32>, vector<32x64xf32>, vector<16x64xf32> -> vector<16x64xf32>
    %7 = arith.addf %3, %6 : vector<16x64xf32>
    %c0_6 = arith.constant 0 : index
    %c0_7 = arith.constant 0 : index
    %8 = vector.load %arg7[%c0_6, %c0_7] : memref<16x64xf32, #tpu.memory_space<vmem>>, vector<16x64xf32>
    tpu.vector_store %arg7[%c0_6, %c0_7], %7 {strides = array<i32>} : memref<16x64xf32, #tpu.memory_space<vmem>>, vector<16x64xf32>,
    %c0_i32_8 = arith.constant 0 : i32
    %9 = arith.cmpi eq, %arg2, %c0_i32_8 : i32
    %10 = arith.extui %9 : i1 to i32
    %c0_i32_9 = arith.constant 0 : i32
    %11 = arith.cmpi ne, %10, %c0_i32_9 : i32
    scf.if %11 {
      %c0_10 = arith.constant 0 : index
      %c0_11 = arith.constant 0 : index
      %12 = vector.load %arg7[%c0_10, %c0_11] : memref<16x64xf32, #tpu.memory_space<vmem>>, vector<16x64xf32>
      %c0_12 = arith.constant 0 : index
      %c0_13 = arith.constant 0 : index
      %13 = vector.load %arg5[%c0_12, %c0_13] : memref<1x64xf32, #tpu.memory_space<vmem>>, vector<1x64xf32>
      %14 = vector.broadcast %13 : vector<1x64xf32> to vector<16x64xf32>
      %15 = arith.addf %12, %14 : vector<16x64xf32>
      %cst_14 = arith.constant 0.000000e+00 : f32
      %16 = vector.broadcast %cst_14 : f32 to vector<16x64xf32>
      %17 = arith.maximumf %15, %16 : vector<16x64xf32>
      %c0_15 = arith.constant 0 : index
      %c0_16 = arith.constant 0 : index
      %18 = vector.load %arg6[%c0_15, %c0_16] : memref<16x64xf32, #tpu.memory_space<vmem>>, vector<16x64xf32>
      tpu.vector_store %arg6[%c0_15, %c0_16], %17 {strides = array<i32>} : memref<16x64xf32, #tpu.memory_space<vmem>>, vector<16x64xf32>,
    } else {
    }
    return
  }
  func.func @transform_0(%arg0: i32, %arg1: i32, %arg2: i32) -> (i32, i32) {
    %c0_i32 = arith.constant 0 : i32
    return %arg0, %arg2 : i32, i32
  }
  func.func @transform_1(%arg0: i32, %arg1: i32, %arg2: i32) -> (i32, i32) {
    %c0_i32 = arith.constant 0 : i32
    return %arg2, %arg1 : i32, i32
  }
  func.func @transform_2(%arg0: i32, %arg1: i32, %arg2: i32) -> (i32, i32) {
    %c0_i32 = arith.constant 0 : i32
    %c0_i32_0 = arith.constant 0 : i32
    return %c0_i32, %arg1 : i32, i32
  }
  func.func @transform_3(%arg0: i32, %arg1: i32, %arg2: i32) -> (i32, i32) {
    %c0_i32 = arith.constant 0 : i32
    return %arg0, %arg1 : i32, i32
  }
}

module attributes {stable_mosaic.version = 11 : i64} {
  func.func @_linear_kernel(%arg0: i32, %arg1: i32, %arg2: i32, %arg3: memref<16x64xf32, #tpu.memory_space<vmem>>, %arg4: memref<64x32xf32, #tpu.memory_space<vmem>>, %arg5: memref<1x32xf32, #tpu.memory_space<vmem>>, %arg6: memref<16x32xf32, #tpu.memory_space<vmem>>, %arg7: memref<16x32xf32, #tpu.memory_space<vmem>>, %arg8: memref<16x32xf32, #tpu.memory_space<vmem>>) attributes {dimension_semantics = [#tpu.dimension_semantics<parallel>, #tpu.dimension_semantics<parallel>, #tpu.dimension_semantics<arbitrary>], iteration_bounds = array<i64: 1, 1, 1>, scalar_prefetch = 0 : i64, scratch_operands = 1 : i64, tpu.core_type = #tpu.core_type<tc>, window_params = [{transform_indices = @transform_0, window_bounds = array<i64: 16, 64>}, {transform_indices = @transform_1, window_bounds = array<i64: 64, 32>}, {transform_indices = @transform_2, window_bounds = array<i64: 1, 32>}, {transform_indices = @transform_3, window_bounds = array<i64: 16, 32>}, {transform_indices = @transform_4, window_bounds = array<i64: 16, 32>}]} {
    %c0_i32 = arith.constant 0 : i32
    %0 = arith.cmpi eq, %arg2, %c0_i32 : i32
    %1 = arith.extui %0 : i1 to i32
    %c0_i32_0 = arith.constant 0 : i32
    %2 = arith.cmpi ne, %1, %c0_i32_0 : i32
    scf.if %2 {
      %cst_10 = arith.constant 0.000000e+00 : f32
      %12 = vector.broadcast %cst_10 : f32 to vector<16x32xf32>
      %c0_11 = arith.constant 0 : index
      %c0_12 = arith.constant 0 : index
      %13 = vector.load %arg8[%c0_11, %c0_12] : memref<16x32xf32, #tpu.memory_space<vmem>>, vector<16x32xf32>
      tpu.vector_store %arg8[%c0_11, %c0_12], %12 {strides = array<i32>} : memref<16x32xf32, #tpu.memory_space<vmem>>, vector<16x32xf32>,
    } else {
    }
    %c0 = arith.constant 0 : index
    %c0_1 = arith.constant 0 : index
    %3 = vector.load %arg8[%c0, %c0_1] : memref<16x32xf32, #tpu.memory_space<vmem>>, vector<16x32xf32>
    %c0_2 = arith.constant 0 : index
    %c0_3 = arith.constant 0 : index
    %4 = vector.load %arg3[%c0_2, %c0_3] : memref<16x64xf32, #tpu.memory_space<vmem>>, vector<16x64xf32>
    %c0_4 = arith.constant 0 : index
    %c0_5 = arith.constant 0 : index
    %5 = vector.load %arg4[%c0_4, %c0_5] : memref<64x32xf32, #tpu.memory_space<vmem>>, vector<64x32xf32>
    %cst = arith.constant dense<0.000000e+00> : vector<16x32xf32>
    %6 = tpu.matmul %4, %5, %cst {dimension_numbers = #tpu.dot_dimension_numbers<[1], [0], [0], [1], [0, 0, 1, 1], [], []>} : vector<16x64xf32>, vector<64x32xf32>, vector<16x32xf32> -> vector<16x32xf32>
    %7 = arith.addf %3, %6 : vector<16x32xf32>
    %c0_6 = arith.constant 0 : index
    %c0_7 = arith.constant 0 : index
    %8 = vector.load %arg8[%c0_6, %c0_7] : memref<16x32xf32, #tpu.memory_space<vmem>>, vector<16x32xf32>
    tpu.vector_store %arg8[%c0_6, %c0_7], %7 {strides = array<i32>} : memref<16x32xf32, #tpu.memory_space<vmem>>, vector<16x32xf32>,
    %c0_i32_8 = arith.constant 0 : i32
    %9 = arith.cmpi eq, %arg2, %c0_i32_8 : i32
    %10 = arith.extui %9 : i1 to i32
    %c0_i32_9 = arith.constant 0 : i32
    %11 = arith.cmpi ne, %10, %c0_i32_9 : i32
    scf.if %11 {
      %c0_10 = arith.constant 0 : index
      %c0_11 = arith.constant 0 : index
      %12 = vector.load %arg8[%c0_10, %c0_11] : memref<16x32xf32, #tpu.memory_space<vmem>>, vector<16x32xf32>
      %c0_12 = arith.constant 0 : index
      %c0_13 = arith.constant 0 : index
      %13 = vector.load %arg5[%c0_12, %c0_13] : memref<1x32xf32, #tpu.memory_space<vmem>>, vector<1x32xf32>
      %14 = vector.broadcast %13 : vector<1x32xf32> to vector<16x32xf32>
      %15 = arith.addf %12, %14 : vector<16x32xf32>
      %c0_14 = arith.constant 0 : index
      %c0_15 = arith.constant 0 : index
      %16 = vector.load %arg6[%c0_14, %c0_15] : memref<16x32xf32, #tpu.memory_space<vmem>>, vector<16x32xf32>
      %17 = arith.addf %15, %16 : vector<16x32xf32>
      %c0_16 = arith.constant 0 : index
      %c0_17 = arith.constant 0 : index
      %18 = vector.load %arg7[%c0_16, %c0_17] : memref<16x32xf32, #tpu.memory_space<vmem>>, vector<16x32xf32>
      tpu.vector_store %arg7[%c0_16, %c0_17], %17 {strides = array<i32>} : memref<16x32xf32, #tpu.memory_space<vmem>>, vector<16x32xf32>,
    } else {
    }
    return
  }
  func.func @transform_0(%arg0: i32, %arg1: i32, %arg2: i32) -> (i32, i32) {
    %c0_i32 = arith.constant 0 : i32
    return %arg0, %arg2 : i32, i32
  }
  func.func @transform_1(%arg0: i32, %arg1: i32, %arg2: i32) -> (i32, i32) {
    %c0_i32 = arith.constant 0 : i32
    return %arg2, %arg1 : i32, i32
  }
  func.func @transform_2(%arg0: i32, %arg1: i32, %arg2: i32) -> (i32, i32) {
    %c0_i32 = arith.constant 0 : i32
    %c0_i32_0 = arith.constant 0 : i32
    return %c0_i32, %arg1 : i32, i32
  }
  func.func @transform_3(%arg0: i32, %arg1: i32, %arg2: i32) -> (i32, i32) {
    %c0_i32 = arith.constant 0 : i32
    return %arg0, %arg1 : i32, i32
  }
  func.func @transform_4(%arg0: i32, %arg1: i32, %arg2: i32) -> (i32, i32) {
    %c0_i32 = arith.constant 0 : i32
    return %arg0, %arg1 : i32, i32
  }
}

</mosaic_0001>

<bundles_post_ra>
// kernel: encoder_block.8
= control target key start
LH: loop header
LB: loop body
LE: loop exit
PB: predicated region body
PF: predicated region fallthrough
CT: control target
= control target key end

     0   :  { %vm29_vm0 = vcmask 261120   ;;  %vm18_vm1 = vcmask 785408   ;;  %v165_v3 = vmov 0.0   ;;  %s221_s1 = inlined_call_operand.vmem [shape: f32[32,96], index: 1, kind: input, shape index: {}]   ;;  %s222_s0 = inlined_call_operand.vmem [shape: f32[16,32], index: 0, kind: input, shape index: {}]   ;;  %s223_s2 = inlined_call_operand.vmem [shape: f32[1,96], index: 2, kind: input, shape index: {}]   ;;  %s224_s3 = inlined_call_operand.vmem [shape: f32[16,96], index: 3, kind: output, shape index: {}]  }
   0x1   :  { %v25_v0 = vld [vmem:[%s221_s1] sm:$0xff]  ;;  %v26_v1 = vld [vmem:[%s221_s1 + $0x8] sm:$0xff]  ;;  %v27_v2 = vld [vmem:[%s221_s1 + $0x10] sm:$0xff]  ;;  %20 = vst.msk [vmem:[#allocation2 + $0x8] sm:$0xff] %vm18_vm1, %v165_v3 }
   0x2   :  { %19 = vst.msk [vmem:[#allocation2] sm:$0xff] %vm18_vm1, %v165_v3  ;;  %v156_v4 = vpack.c.bf16 %v26_v1, %v25_v0  ;;  %v28_v5 = vld [vmem:[%s221_s1 + $0x18] sm:$0xff]  ;;  %v23_v6 = vld [vmem:[%s222_s0] sm:$0xff]  ;;  %v24_v8 = vld [vmem:[%s222_s0 + $0x8] sm:$0xff] }
   0x3   :  { %v160_v7 = vpack.c.bf16 %v28_v5, %v27_v2  ;;  %153 = vmatprep.mubr.msk.f32.mxu0 %vm29_vm0, %v23_v6  ;;  %v138_v15 = vld [vmem:[%s223_s2] ss:$0 sm:$0xff] }
   0x4   :  { %157 = vmatprep.subr.bf16.mxu0 %v156_v4 }
   0x5   :  { %159 = vmatpush3.bf16.msra.mxu0 %v156_v4 }
   0x6   :  { %161 = vmatprep.subr.bf16.mxu0 %v160_v7 }
   0x8   :  { %v22_v9 = vld [vmem:[#allocation2 + $0x8] sm:$0xff] }
   0x9   :  { %163 = vmatpush3.bf16.msra.mxu0 %v160_v7  ;;  %v21_v10 = vld [vmem:[#allocation2] sm:$0xff] }
   0xc   :  { %154 = vmatmul.mubr.msk.f32.vlgmr.msra.gmra.mrb[0].mxu0 %vm29_vm0, %v24_v8 }
  0xdf   :  { %v155_v11 = vpop.f32.mrb[0].mxu0 }
  0xe0   :  { %v112_v12 = vadd.f32 %v155_v11, %v22_v9  ;;  %v102_v13 = vpop.f32.mrb[1].mxu0 }
  0xe1   :  { %v111_v14 = vadd.f32 %v102_v13, %v21_v10 }
  0xe2   :  { %115 = vst.msk [vmem:[#allocation2 + $0x8] sm:$0xff] %vm18_vm1, %v112_v12 }
  0xe3   :  { %114 = vst.msk [vmem:[#allocation2] sm:$0xff] %vm18_vm1, %v111_v14 }
  0xe9   :  { %v120_v16 = vld [vmem:[#allocation2 + $0x8] sm:$0xff] }
  0xea   :  { %v129_v17 = vadd.f32 %v138_v15, %v120_v16  ;;  %v119_v18 = vld [vmem:[#allocation2] sm:$0xff] }
  0xeb   :  { %v128_v19 = vadd.f32 %v138_v15, %v119_v18 }
  0xec   :  { %131 = vst.msk [vmem:[%s224_s3 + $0x8] sm:$0xff] %vm18_vm1, %v129_v17 }
  0xed   :  { %130 = vst.msk [vmem:[%s224_s3] sm:$0xff] %vm18_vm1, %v128_v19 }

// kernel: encoder_block.7
= control target key start
LH: loop header
LB: loop body
LE: loop exit
PB: predicated region body
PF: predicated region fallthrough
CT: control target
= control target key end

     0   :  { %7 = vsyncpa [#allocation3], 0  ;;  %s144_s0 = inlined_call_operand.vmem [shape: f32[16,32], index: 0, kind: input, shape index: {}]   ;;  %s145_s1 = inlined_call_operand.vmem [shape: f32[2], index: 1, kind: input, shape index: {}]   ;;  %s146_s2 = inlined_call_operand.vmem [shape: f32[16,32], index: 2, kind: output, shape index: {}]  }
   0x1   :  { %s16_s11 = sshll.u32 %s145_s1, 4  ;;  %s17_s11 = int_to_ptr.vmem [resolvable:$true] %s16_s11 }
   0x2   :  { %s93_s12 = scalar_lea.vmem %s17_s11, 16  ;;  %p98_p1 = scmp.lt.s32.totalorder %s17_s11, %s17_s11 }
   0x3   :  { %p94_p0 = scmp.ne.s32.totalorder %s17_s11, %s93_s12  ;;  %p99_p2 = scmp.lt.s32.totalorder %s93_s12, %s93_s12 }
   0x5   :  { %p100_p3 = por %p99_p2, %p98_p1 }
   0x7   :  { %p101_p4 = pnand %p100_p3, %p94_p0 }
   0x9   :  { %104 = shalt.err (!%p101_p4)
}
   0xa   :  { %s107_s13 = smov [#allocation2]  }
   0xb   :  { %19 = dma.vmem_to_smem %s17_s11, 16, %s107_s13, [#allocation3]  }
   0xc   :  { %105 = dma.done.wait [#allocation3], 16  }
   0xd   :  { %106 = vsyncadd [#allocation3], 4294967280 }
   0xe   :  { %23 = sfence }
   0xf   :  { %v24_v0 = vld [vmem:[%s144_s0] sm:$0xff]  ;;  %vm26_vm0 = vcmask 261120   ;;  %v25_v1 = vld [vmem:[%s144_s0 + $0x8] sm:$0xff]  ;;  %s68_s0 = sld [smem:[#allocation2]]  ;;  %s83_s17 = sld [smem:[#allocation2 + $0x1]] }
  0x10   :  { %v27_v2 = vsel %vm26_vm0, %v24_v0, 0.0  ;;  %v30_v3 = vsel %vm26_vm0, %v25_v1, 0.0 }
  0x11   :  { %28 = vadd.xlane.f32.xlu0 %v27_v2 }
  0x15   :  { %31 = vadd.xlane.f32.xlu0 %v30_v3  ;;  %v69_v31 = vstv %s68_s0  ;;  %v73_v33 = vstv %s83_s17 }
  0x9e   :  { %v29_v4 = vpop.xlane.xlu0 %28 }
  0x9f   :  { %v34_v5 = vmul.f32 0.03125, %v29_v4 }
  0xa1   :  { %v36_v6 = vsub.f32 %v24_v0, %v34_v5 }
  0xa2   :  { %v32_v7 = vpop.xlane.xlu0 %31 }
  0xa3   :  { %v35_v8 = vmul.f32 0.03125, %v32_v7  ;;  %v38_v9 = vmul.f32 %v36_v6, %v36_v6 }
  0xa5   :  { %v37_v10 = vsub.f32 %v25_v1, %v35_v8  ;;  %v40_v11 = vsel %vm26_vm0, %v38_v9, 0.0 }
  0xa6   :  { %41 = vadd.xlane.f32.xlu1 %v40_v11 }
  0xa7   :  { %v39_v12 = vmul.f32 %v37_v10, %v37_v10 }
  0xa9   :  { %v43_v13 = vsel %vm26_vm0, %v39_v12, 0.0 }
  0xaa   :  { %44 = vadd.xlane.f32.xlu1 %v43_v13 }
 0x133   :  { %v42_v14 = vpop.xlane.xlu1 %41 }
 0x134   :  { %v46_v15 = vmul.f32 0.032258064, %v42_v14 }
 0x136   :  { %85 = vrsqrt.f32 %v46_v15  ;;  %vm50_vm1 = vcmp.eq.f32.partialorder %v46_v15, inf  ;;  %v53_v20 = vand.u32 2147483648, %v46_v15  ;;  %vm52_vm2 = vcmp.eq.f32.partialorder %v46_v15, 0.0 }
 0x137   :  { %v45_v16 = vpop.xlane.xlu1 %44 }
 0x138   :  { %v47_v17 = vmul.f32 0.032258064, %v45_v16 }
 0x13a   :  { %87 = vrsqrt.f32 %v47_v17  ;;  %vm57_vm3 = vcmp.eq.f32.partialorder %v47_v17, inf  ;;  %v60_v26 = vand.u32 2147483648, %v47_v17  ;;  %vm59_vm4 = vcmp.eq.f32.partialorder %v47_v17, 0.0 }
 0x140   :  { %v86_v18 = vpop.eup %85 }
 0x141   :  { %v49_v19 = vmul.f32 %v86_v18, %v46_v15 }
 0x143   :  { %v51_v21 = vsel %vm50_vm1, %v46_v15, %v49_v19 }
 0x144   :  { %v88_v22 = vpop.eup %87  ;;  %v54_v23 = vsel %vm52_vm2, %v53_v20, %v51_v21 }
 0x145   :  { %v62_v24 = vadd.f32 1e-06, %v54_v23  ;;  %v56_v25 = vmul.f32 %v88_v22, %v47_v17 }
 0x147   :  { %89 = vrcp.f32 %v62_v24  ;;  %v58_v27 = vsel %vm57_vm3, %v47_v17, %v56_v25 }
 0x148   :  { %v61_v28 = vsel %vm59_vm4, %v60_v26, %v58_v27 }
 0x149   :  { %v63_v29 = vadd.f32 1e-06, %v61_v28 }
 0x14b   :  { %91 = vrcp.f32 %v63_v29 }
 0x151   :  { %v90_v30 = vpop.eup %89 }
 0x152   :  { %v65_v32 = vmul.f32 %v90_v30, %v36_v6 }
 0x154   :  { %v70_v34 = vmul.f32 %v69_v31, %v65_v32 }
 0x155   :  { %v92_v35 = vpop.eup %91 }
 0x156   :  { %v74_v36 = vadd.f32 %v73_v33, %v70_v34  ;;  %v67_v37 = vmul.f32 %v92_v35, %v37_v10 }
 0x158   :  { %76 = vst.msk [vmem:[%s146_s2] sm:$0xff] %vm26_vm0, %v74_v36  ;;  %v71_v38 = vmul.f32 %v69_v31, %v67_v37 }
 0x15a   :  { %v75_v39 = vadd.f32 %v73_v33, %v71_v38 }
 0x15c   :  { %77 = vst.msk [vmem:[%s146_s2 + $0x8] sm:$0xff] %vm26_vm0, %v75_v39 }
 0x15d   :  { %82 = vsyncpa [#allocation3], 1 }

// kernel: encoder_block.10
= control target key start
LH: loop header
LB: loop body
LE: loop exit
PB: predicated region body
PF: predicated region fallthrough
CT: control target
= control target key end

     0   :  { %vm21_vm0 = vcmask 261120   ;;  %v171_v3 = vmov 0.0   ;;  %s238_s1 = inlined_call_operand.vmem [shape: f32[32,32], index: 1, kind: input, shape index: {}]   ;;  %s239_s0 = inlined_call_operand.vmem [shape: f32[16,32], index: 0, kind: input, shape index: {}]   ;;  %s240_s2 = inlined_call_operand.vmem [shape: f32[1,32], index: 2, kind: input, shape index: {}]   ;;  %s241_s3 = inlined_call_operand.vmem [shape: f32[16,32], index: 3, kind: input, shape index: {}]   ;;  %s242_s4 = inlined_call_operand.vmem [shape: f32[16,32], index: 4, kind: output, shape index: {}]  }
   0x1   :  { %v28_v0 = vld [vmem:[%s238_s1] sm:$0xff]  ;;  %v29_v1 = vld [vmem:[%s238_s1 + $0x8] sm:$0xff]  ;;  %v30_v2 = vld [vmem:[%s238_s1 + $0x10] sm:$0xff]  ;;  %23 = vst.msk [vmem:[#allocation2 + $0x8] sm:$0xff] %vm21_vm0, %v171_v3 }
   0x2   :  { %22 = vst.msk [vmem:[#allocation2] sm:$0xff] %vm21_vm0, %v171_v3  ;;  %v162_v4 = vpack.c.bf16 %v29_v1, %v28_v0  ;;  %v31_v5 = vld [vmem:[%s238_s1 + $0x18] sm:$0xff]  ;;  %v26_v6 = vld [vmem:[%s239_s0] sm:$0xff]  ;;  %v27_v8 = vld [vmem:[%s239_s0 + $0x8] sm:$0xff] }
   0x3   :  { %v166_v7 = vpack.c.bf16 %v31_v5, %v30_v2  ;;  %159 = vmatprep.mubr.msk.f32.mxu0 %vm21_vm0, %v26_v6  ;;  %v144_v15 = vld [vmem:[%s240_s2] ss:$0 sm:$0xff]  ;;  %v133_v17 = vld [vmem:[%s241_s3 + $0x8] sm:$0xff] }
   0x4   :  { %163 = vmatprep.subr.bf16.mxu0 %v162_v4  ;;  %v132_v20 = vld [vmem:[%s241_s3] sm:$0xff] }
   0x5   :  { %165 = vmatpush3.bf16.msra.mxu0 %v162_v4 }
   0x6   :  { %167 = vmatprep.subr.bf16.mxu0 %v166_v7 }
   0x8   :  { %v25_v9 = vld [vmem:[#allocation2 + $0x8] sm:$0xff] }
   0x9   :  { %169 = vmatpush3.bf16.msra.mxu0 %v166_v7  ;;  %v24_v10 = vld [vmem:[#allocation2] sm:$0xff] }
   0xc   :  { %160 = vmatmul.mubr.msk.f32.vlgmr.msra.gmra.mrb[0].mxu0 %vm21_vm0, %v27_v8 }
  0xdf   :  { %v161_v11 = vpop.f32.mrb[0].mxu0 }
  0xe0   :  { %v115_v12 = vadd.f32 %v161_v11, %v25_v9  ;;  %v105_v13 = vpop.f32.mrb[1].mxu0 }
  0xe1   :  { %v114_v14 = vadd.f32 %v105_v13, %v24_v10 }
  0xe2   :  { %117 = vst.msk [vmem:[#allocation2 + $0x8] sm:$0xff] %vm21_vm0, %v115_v12 }
  0xe3   :  { %116 = vst.msk [vmem:[#allocation2] sm:$0xff] %vm21_vm0, %v114_v14 }
  0xe9   :  { %v122_v16 = vld [vmem:[#allocation2 + $0x8] sm:$0xff] }
  0xea   :  { %v131_v18 = vadd.f32 %v144_v15, %v122_v16  ;;  %v121_v19 = vld [vmem:[#allocation2] sm:$0xff] }
  0xeb   :  { %v130_v21 = vadd.f32 %v144_v15, %v121_v19 }
  0xec   :  { %v135_v22 = vadd.f32 %v133_v17, %v131_v18 }
  0xed   :  { %v134_v23 = vadd.f32 %v132_v20, %v130_v21 }
  0xee   :  { %137 = vst.msk [vmem:[%s242_s4 + $0x8] sm:$0xff] %vm21_vm0, %v135_v22 }
  0xef   :  { %136 = vst.msk [vmem:[%s242_s4] sm:$0xff] %vm21_vm0, %v134_v23 }

// kernel: encoder_block.9
= control target key start
LH: loop header
LB: loop body
LE: loop exit
PB: predicated region body
PF: predicated region fallthrough
CT: control target
= control target key end

     0   :  { %s1486_s15 = smov 0   ;;  %s1488_s16 = smov 0   ;;  %s1668_s0 = inlined_call_operand.vmem [shape: f32[2,8,32], index: 0, kind: input, shape index: {}]   ;;  %s1669_s1 = inlined_call_operand.vmem [shape: f32[2,8,32], index: 1, kind: input, shape index: {}]   ;;  %s1670_s2 = inlined_call_operand.vmem [shape: f32[2,8,32], index: 2, kind: input, shape index: {}]   ;;  %s1671_s3 = inlined_call_operand.vmem [shape: s8[2,8,8], index: 3, kind: input, shape index: {}]   ;;  %s1672_s4 = inlined_call_operand.vmem [shape: f32[2,8,32], index: 4, kind: output, shape index: {}]  }
   0x1   :  { %s1490_s17 = smov 0  }
   0x2 LB: > { %s33_s18 = sadd.s32 1, %s1442_s16  ;;  %p1280_p0 = scmp.ge.s32.totalorder %s1446_s17, 1  ;;  %s1446_s17 = sphi %s1490_s17, %s14_s17   ;;  %s1442_s16 = sphi %s1488_s16, %s1676_s16   ;;  %s1438_s15 = sphi %s1486_s15, %s1675_s15  }
   0x3   : > { %p35_p1 = scmp.ge.s32.totalorder %s33_s18, 2  ;;  %p234_p2 = scmp.lt.s32.totalorder %s1446_s17, 3 }
   0x5   : > { %s1678_s18 = smov (%p35_p1, %s33_s18), 0  ;;  %p235_p3 = pnand %p1280_p0, %p234_p2 }
   0x6   : > { %p288_p4 = scmp.lt.s32.totalorder (!%p235_p3), %s1438_s15, 1  ;;  %v1448_v0 = vmov (!%p235_p3), 0.0   ;;  %vm1449_vm0 = vmmov (!%p235_p3), 0   ;;  %vm342_vm1 = vcmask (!%p235_p3), 64512   ;;  %v1450_v3 = vmov (!%p235_p3), 0   ;;  %s1452_s30 = smov (!%p235_p3), 120  }
   0x7   : > { %238 = sbr.rel (%p235_p3) target bundleno = 1405 (0x57d), region = 36  ;;  %1316 = vmatprep.subr.mxu0 (!%p235_p3), %v1448_v0  ;;  %1318 = vmatprep.mubr.msk.f32.mxu0 (!%p235_p3), %vm1449_vm0, %v1448_v0  ;;  %vm332_vm2 = vcmask (!%p235_p3), 31744   ;;  %v1451_v4 = vmov (!%p235_p3), -inf   ;;  %s1453_s5 = smov (!%p235_p3), 112   ;;  %vm446_vm5 = vcmask (!%p235_p3), 7168   ;;  %v1455_v46 = vmov (!%p235_p3), 1  }
   0x8   : > { %1321 = vmatprep.subr.mxu1 (!%p235_p3), %v1448_v0  ;;  %1323 = vmatprep.mubr.msk.f32.mxu1 (!%p235_p3), %vm1449_vm0, %v1448_v0  ;;  %333 = vst.msk [vmem:[#allocation2] sm:$0xff] (!%p235_p3), %vm332_vm2, %v1451_v4  ;;  %334 = vst.msk [vmem:[#allocation3] sm:$0xff] (!%p235_p3), %vm332_vm2, %v1448_v0  ;;  %s1454_s6 = smov (!%p235_p3), 104   ;;  %v1456_v47 = vmov (!%p235_p3), 2   ;;  %vm633_vm6 = vcmask (!%p235_p3), 15368   ;;  %v1457_v54 = vmov (!%p235_p3), 3  }
   0x9   : > { %1393 = vset.pattern.permute.xlu0 (!%p235_p3), %v1450_v3  ;;  %1394 = vset.pattern.permute.xlu1 (!%p235_p3), %v1455_v46  ;;  %vm829_vm7 = vcmask (!%p235_p3), 23568   ;;  %vm335_vm8 = vcmask (!%p235_p3), 261120   ;;  %vm1024_vm9 = vcmask (!%p235_p3), 31768   ;;  %s1458_s10 = smov (!%p235_p3), 8   ;;  %s1459_s11 = smov (!%p235_p3), 16   ;;  %vm724_vm10 = vcmask (!%p235_p3), 130112  }
   0xa   : > { %336 = vst.msk [vmem:[#allocation4] sm:$0xff] (!%p235_p3), %vm335_vm8, %v1448_v0  ;;  %s1460_s12 = smov (!%p235_p3), 24   ;;  %vm919_vm11 = vcmask (!%p235_p3), 195712   ;;  %vm1114_vm12 = vcmask (!%p235_p3), 261312   ;;  %vm1145_vm13 = vcmask (!%p235_p3), 130048   ;;  %vm1147_vm14 = vcmask (!%p235_p3), 195584  }
   0xe   : > { %s1680_s15 = smov (!%p288_p4, %s1438_s15), 1 }
   0xf   : > { %s1510_s19 = sshll.u32 %s1680_s15, 3  ;;  %s1284_s26 = sshll.u32 %s1680_s15, 1  ;;  %v424_v14 = vld [vmem:[#allocation2] sm:$0xff] }
  0x10   : > { %s301_s22 = scalar_lea.vmem %s1669_s1, %s1510_s19  ;;  %s294_s25 = scalar_lea.vmem %s1668_s0, %s1510_s19 }
  0x11   : > { %v338_v1 = vld [vmem:[%s301_s22] sm:$0xff]  ;;  %s318_s29 = scalar_lea.vmem %s1671_s3, %s1284_s26  ;;  %s308_s9 = scalar_lea.vmem %s1670_s2, %s1510_s19 }
  0x12   : > { %1317 = vmatpush3.xpose.msk.msra.mxu0 %vm342_vm1, %v338_v1  ;;  %v337_v2 = vld [vmem:[%s294_s25] sm:$0xff]  ;;  %533 = vrot.lane.b32.xlu1 %v338_v1, %s1452_s30  ;;  %s325_s15 = scalar_lea.vmem %s1672_s4, %s1510_s19 }
  0x13   : > { %1331 = vmatprep.subr.mxu0 %v1448_v0  ;;  %v340_v5 = vld [vmem:[%s318_s29] sm:$0x3] }
  0x14   : > { %vm341_vm3 = vnez %v340_v5  ;;  %v1549_v18 = vld [vmem:[%s308_s9] sm:$0xff] }
  0x15   : > { %1319 = vmatmul.mubr.msk.f32.vlgmr.msra.gmra.mrb[0].mxu0 %vm342_vm1, %v337_v2  ;;  %v420_v6 = vsel %vm341_vm3, 16843009, %v1450_v3  ;;  %1322 = vmatpush3.msra.mxu1 %v1549_v18 }
  0x16   : > { %1333 = vmatprep.mubr.msk.f32.mxu0 %vm1449_vm0, %v1448_v0  ;;  %v421_v7 = vunpack.c.0.s8 %v420_v6  ;;  %531 = vrot.lane.b32.xlu1 %v337_v2, %s1452_s30 }
  0x17   : > { %1326 = vmatprep.subr.mxu1 %v1448_v0 }
  0x18   : > { %vm1531_vm4 = vcmp.ne.s32.totalorder %v421_v7, 0 }
  0x1a   : > { %729 = vrot.lane.b32.xlu1 %v338_v1, %s1453_s5 }
  0x1e   : > { %727 = vrot.lane.b32.xlu1 %v337_v2, %s1453_s5 }
  0x22   : > { %924 = vrot.lane.b32.xlu1 %v338_v1, %s1454_s6 }
  0x26   : > { %922 = vrot.lane.b32.xlu1 %v337_v2, %s1454_s6 }
  0x84   : > { %v534_v19 = vpop.permute.xlu1 %533 }
  0x88   : > { %v532_v23 = vpop.permute.xlu1 %531 }
  0x8c   : > { %v730_v24 = vpop.permute.xlu1 %729 }
  0x90   : > { %v728_v26 = vpop.permute.xlu1 %727 }
  0x94   : > { %v925_v27 = vpop.permute.xlu1 %924 }
  0x98   : > { %v923_v28 = vpop.permute.xlu1 %922 }
  0xe8   : > { %v415_v8 = vpop.f32.mrb[0].mxu0 }
  0xe9   : > { %v419_v10 = vmul.f32 0.35355338, %v415_v8  ;;  %v1320_v11 = vpop.f32.mrb[1].mxu0 }
  0xea   : > { %v448_v11 = vld [vmem:[#allocation4] sm:$0xff] }
  0xeb   : > { %v423_v12 = vsel %vm1531_vm4, %v419_v10, -1e+09 }
  0xec   : > { %v425_v13 = vsel %vm342_vm1, %v423_v12, -inf }
  0xed   : > { %426 = vmax.xlane.f32.xlu0 %v425_v13 }
 0x17a   : > { %v427_v15 = vpop.xlane.xlu0 %426 }
 0x17b   : > { %v428_v16 = vmax.f32 %v424_v14, %v427_v15 }
 0x17d   : > { %v429_v17 = vsub.f32 %v424_v14, %v428_v16  ;;  %530 = vst.msk [vmem:[#allocation2] sm:$0xff] %vm446_vm5, %v428_v16  ;;  %434 = vperm.xlu0 %1393, %v428_v16  }
 0x17f   : > { %v430_v51 = vmul.f32 1.442695, %v429_v17 }
 0x181   : > { %1395 = vset.pattern.permute.xlu0 %v1456_v47 }
 0x184   : > { %v611_v49 = vld [vmem:[#allocation2] sm:$0xff] }
 0x1fc   : > { %v435_v20 = vpop.permute.xlu0 %434 }
 0x1fd   : > { %v437_v21 = vsub.f32 %v423_v12, %v435_v20 }
 0x1ff   : > { %v438_v22 = vmul.f32 1.442695, %v437_v21 }
 0x201   : > { %1406 = vpow2.f32 %v438_v22 }
 0x202   : > { %1408 = vpow2.f32 %v430_v51 }
 0x20b   : > { %v1553_v25 = vpop.eup %1406 }
 0x20c   : > { %1324 = vmatmul.mubr.msk.f32.vlgmr.msra.gmra.mrb[0].mxu1 %vm342_vm1, %v1553_v25  ;;  %v1600_v58 = vpop.eup %1408  ;;  %v442_v63 = vsel %vm342_vm1, %v1553_v25, 0.0 }
 0x20d   : > { %1327 = vmatpush3.xpose.msk.msra.mxu1 %vm342_vm1, %v534_v19  ;;  %1328 = vmatprep.mubr.msk.f32.mxu1 %vm1449_vm0, %v1448_v0 }
 0x20e   : > { %1336 = vmatprep.subr.mxu1 %v1448_v0 }
 0x210   : > { %1329 = vmatmul.mubr.msk.f32.vlgmr.msra.gmra.mrb[2].mxu1 %vm342_vm1, %v532_v23 }
 0x211   : > { %1337 = vmatpush3.xpose.msk.msra.mxu1 %vm342_vm1, %v730_v24  ;;  %1338 = vmatprep.mubr.msk.f32.mxu1 %vm1449_vm0, %v1448_v0 }
 0x212   : > { %1346 = vmatprep.subr.mxu1 %v1448_v0 }
 0x214   : > { %1339 = vmatmul.mubr.msk.f32.vlgmr.msra.gmra.mrb[4].mxu1 %vm342_vm1, %v728_v26 }
 0x215   : > { %1347 = vmatpush3.xpose.msk.msra.mxu1 %vm342_vm1, %v925_v27  ;;  %1348 = vmatprep.mubr.msk.f32.mxu1 %vm1449_vm0, %v1448_v0 }
 0x218   : > { %1349 = vmatmul.mubr.msk.f32.vlgmr.msra.gmra.mrb[6].mxu1 %vm342_vm1, %v923_v28  ;;  %v440_v28 = vld [vmem:[#allocation3] sm:$0xff] }
 0x2df   : > { %v1571_v29 = vpop.f32.mrb[0].mxu1 }
 0x2e0   : > { %v1325_v30 = vpop.f32.mrb[1].mxu1 }
 0x2e3   : > { %v605_v31 = vpop.f32.mrb[2].mxu1 }
 0x2e4   : > { %v609_v32 = vmul.f32 0.35355338, %v605_v31  ;;  %v1330_v33 = vpop.f32.mrb[3].mxu1 }
 0x2e6   : > { %v1575_v34 = vsel %vm1531_vm4, %v609_v32, -1e+09 }
 0x2e7   : > { %v612_v35 = vsel %vm342_vm1, %v1575_v34, -inf  ;;  %v801_v36 = vpop.f32.mrb[4].mxu1 }
 0x2e8   : > { %613 = vmax.xlane.f32.xlu1 %v612_v35  ;;  %v805_v37 = vmul.f32 0.35355338, %v801_v36  ;;  %v1340_v38 = vpop.f32.mrb[5].mxu1 }
 0x2ea   : > { %v1581_v39 = vsel %vm1531_vm4, %v805_v37, -1e+09 }
 0x2eb   : > { %v808_v40 = vsel %vm342_vm1, %v1581_v39, -inf  ;;  %v996_v41 = vpop.f32.mrb[6].mxu1 }
 0x2ec   : > { %809 = vmax.xlane.f32.xlu0 %v808_v40  ;;  %v1000_v42 = vmul.f32 0.35355338, %v996_v41  ;;  %v1350_v43 = vpop.f32.mrb[7].mxu1 }
 0x2ee   : > { %v1587_v44 = vsel %vm1531_vm4, %v1000_v42, -1e+09 }
 0x2ef   : > { %v1003_v45 = vsel %vm342_vm1, %v1587_v44, -inf }
 0x2f0   : > { %1004 = vmax.xlane.f32.xlu1 %v1003_v45 }
 0x375   : > { %v614_v48 = vpop.xlane.xlu1 %613 }
 0x376   : > { %v615_v50 = vmax.f32 %v611_v49, %v614_v48 }
 0x378   : > { %v616_v52 = vsub.f32 %v611_v49, %v615_v50  ;;  %726 = vst.msk [vmem:[#allocation2] sm:$0xff] %vm633_vm6, %v615_v50  ;;  %621 = vperm.xlu1 %1394, %v615_v50  }
 0x379   : > { %v810_v53 = vpop.xlane.xlu0 %809 }
 0x37a   : > { %v617_v1 = vmul.f32 1.442695, %v616_v52 }
 0x37c   : > { %643 = vrot.lane.b32.xlu1 %v1549_v18, %s1452_s30  ;;  %1410 = vpow2.f32 %v617_v1 }
 0x37d   : > { %1396 = vset.pattern.permute.xlu1 %v1457_v54  ;;  %v1005_v59 = vpop.xlane.xlu1 %1004 }
 0x37f   : > { %v807_v55 = vld [vmem:[#allocation2] sm:$0xff] }
 0x380   : > { %v811_v56 = vmax.f32 %v807_v55, %v810_v53 }
 0x382   : > { %v812_v57 = vsub.f32 %v807_v55, %v811_v56  ;;  %921 = vst.msk [vmem:[#allocation2] sm:$0xff] %vm829_vm7, %v811_v56  ;;  %817 = vperm.xlu0 %1395, %v811_v56  }
 0x384   : > { %v813_v24 = vmul.f32 1.442695, %v812_v57 }
 0x386   : > { %1397 = vset.pattern.permute.xlu0 %v1450_v3  ;;  %v1411_v2 = vpop.eup %1410 }
 0x387   : > { %451 = vperm.xlu0 %1397, %v1600_v58  }
 0x389   : > { %v1604_v60 = vld [vmem:[#allocation2] sm:$0xff] }
 0x38a   : > { %v1607_v61 = vmax.f32 %v1604_v60, %v1005_v59 }
 0x38b   : > { %1400 = vset.pattern.permute.xlu0 %v1457_v54 }
 0x38c   : > { %v1007_v62 = vsub.f32 %v1604_v60, %v1607_v61  ;;  %1116 = vst.msk [vmem:[#allocation2] sm:$0xff] %vm1024_vm9, %v1607_v61  ;;  %1012 = vperm.xlu1 %1396, %v1607_v61  }
 0x38e   : > { %v1008_v35 = vmul.f32 1.442695, %v1007_v62 }
 0x390   : > { %838 = vrot.lane.b32.xlu1 %v1549_v18, %s1453_s5 }
 0x391   : > { %1398 = vset.pattern.permute.xlu1 %v1455_v46 }
 0x394   : > { %1033 = vrot.lane.b32.xlu1 %v1549_v18, %s1454_s6 }
 0x3b8   : > { %443 = vadd.xlane.f32.xlu1 %v442_v63 }
 0x3c9   : > { %638 = vperm.xlu1 %1398, %v1411_v2  }
 0x3cd   : > { %1399 = vset.pattern.permute.xlu1 %v1456_v47 }
 0x3f7   : > { %v622_v4 = vpop.permute.xlu1 %621 }
 0x3f8   : > { %v624_v5 = vsub.f32 %v1575_v34, %v622_v4 }
 0x3fa   : > { %v625_v6 = vmul.f32 1.442695, %v624_v5 }
 0x3fb   : > { %v644_v7 = vpop.permute.xlu1 %643 }
 0x3fc   : > { %1412 = vpow2.f32 %v625_v6  ;;  %1332 = vmatpush3.msra.mxu0 %v644_v7 }
 0x3fd   : > { %1341 = vmatprep.subr.mxu0 %v1448_v0 }
 0x401   : > { %v818_v8 = vpop.permute.xlu0 %817 }
 0x402   : > { %v820_v9 = vsub.f32 %v1581_v39, %v818_v8 }
 0x404   : > { %v821_v10 = vmul.f32 1.442695, %v820_v9 }
 0x406   : > { %v1413_v12 = vpop.eup %1412  ;;  %1414 = vpow2.f32 %v821_v10  ;;  %v452_v13 = vpop.permute.xlu0 %451 }
 0x407   : > { %v454_v14 = vmul.f32 %v452_v13, %v448_v11  ;;  %1334 = vmatmul.mubr.msk.f32.vlgmr.msra.gmra.mrb[2].mxu0 %vm342_vm1, %v1413_v12  ;;  %v629_v15 = vsel %vm342_vm1, %v1413_v12, 0.0 }
 0x408   : > { %630 = vadd.xlane.f32.xlu0 %v629_v15  ;;  %1343 = vmatprep.mubr.msk.f32.mxu0 %vm1449_vm0, %v1448_v0 }
 0x409   : > { %v528_v16 = vadd.f32 %v1571_v29, %v454_v14  ;;  %v441_v29 = vmul.f32 %v1600_v58, %v440_v28 }
 0x40b   : > { %529 = vst.msk [vmem:[#allocation4] sm:$0xff] %vm342_vm1, %v528_v16  ;;  %v1013_v17 = vpop.permute.xlu1 %1012 }
 0x40c   : > { %v1015_v18 = vsub.f32 %v1587_v44, %v1013_v17 }
 0x40e   : > { %v1016_v19 = vmul.f32 1.442695, %v1015_v18 }
 0x40f   : > { %v839_v20 = vpop.permute.xlu1 %838 }
 0x410   : > { %v1415_v21 = vpop.eup %1414  ;;  %1416 = vpow2.f32 %v1016_v19  ;;  %1342 = vmatpush3.msra.mxu0 %v839_v20 }
 0x411   : > { %1344 = vmatmul.mubr.msk.f32.vlgmr.msra.gmra.mrb[4].mxu0 %vm342_vm1, %v1415_v21  ;;  %v825_v22 = vsel %vm342_vm1, %v1415_v21, 0.0  ;;  %1351 = vmatprep.subr.mxu0 %v1448_v0  ;;  %1418 = vpow2.f32 %v813_v24 }
 0x412   : > { %826 = vadd.xlane.f32.xlu1 %v825_v22  ;;  %1353 = vmatprep.mubr.msk.f32.mxu0 %vm1449_vm0, %v1448_v0  ;;  %1420 = vpow2.f32 %v1008_v35 }
 0x413   : > { %v1034_v23 = vpop.permute.xlu1 %1033 }
 0x414   : > { %1352 = vmatpush3.msra.mxu0 %v1034_v23 }
 0x41a   : > { %v1417_v25 = vpop.eup %1416 }
 0x41b   : > { %1354 = vmatmul.mubr.msk.f32.vlgmr.msra.gmra.mrb[6].mxu0 %vm342_vm1, %v1417_v25  ;;  %v1020_v26 = vsel %vm342_vm1, %v1417_v25, 0.0  ;;  %v1419_v27 = vpop.eup %1418 }
 0x41c   : > { %1021 = vadd.xlane.f32.xlu0 %v1020_v26  ;;  %v1421_v40 = vpop.eup %1420 }
 0x423   : > { %834 = vperm.xlu1 %1399, %v1419_v27  }
 0x427   : > { %1401 = vset.pattern.permute.xlu1 %v1450_v3 }
 0x445   : > { %v444_v30 = vpop.xlane.xlu1 %443 }
 0x446   : > { %v445_v31 = vadd.f32 %v444_v30, %v441_v29 }
 0x448   : > { %447 = vst.msk [vmem:[#allocation3] sm:$0xff] %vm446_vm5, %v445_v31 }
 0x449   : > { %v639_v36 = vpop.permute.xlu1 %638 }
 0x44f   : > { %v627_v0 = vld [vmem:[#allocation3] sm:$0xff] }
 0x450   : > { %v628_v32 = vmul.f32 %v1411_v2, %v627_v0 }
 0x495   : > { %v631_v33 = vpop.xlane.xlu0 %630 }
 0x496   : > { %v632_v34 = vadd.f32 %v631_v33, %v628_v32 }
 0x498   : > { %634 = vst.msk [vmem:[#allocation3] sm:$0xff] %vm633_vm6, %v632_v34 }
 0x49f   : > { %v823_v37 = vld [vmem:[#allocation3] sm:$0xff]  ;;  %v827_v38 = vpop.xlane.xlu1 %826 }
 0x4a0   : > { %v824_v3 = vmul.f32 %v1419_v27, %v823_v37 }
 0x4a2   : > { %v828_v39 = vadd.f32 %v827_v38, %v824_v3 }
 0x4a3   : > { %v835_v59 = vpop.permute.xlu1 %834 }
 0x4a4   : > { %830 = vst.msk [vmem:[#allocation3] sm:$0xff] %vm829_vm7, %v828_v39 }
 0x4a9   : > { %v1022_v43 = vpop.xlane.xlu0 %1021 }
 0x4ab   : > { %v1018_v41 = vld [vmem:[#allocation3] sm:$0xff] }
 0x4ac   : > { %v1019_v42 = vmul.f32 %v1421_v40, %v1018_v41 }
 0x4ae   : > { %v1023_v44 = vadd.f32 %v1022_v43, %v1019_v42 }
 0x4b0   : > { %1025 = vst.msk [vmem:[#allocation3] sm:$0xff] %vm1024_vm9, %v1023_v44 }
 0x4b7   : > { %v1120_v45 = vld [vmem:[#allocation3] sm:$0xff] }
 0x4b8   : > { %1422 = vrcp.f32 %v1120_v45 }
 0x4c2   : > { %v1423_v48 = vpop.eup %1422 }
 0x4c3   : > { %1125 = vperm.xlu1 %1401, %v1423_v48  }
 0x4c7   : > { %1403 = vset.pattern.permute.xlu1 %v1456_v47  ;;  %v635_v47 = vld [vmem:[#allocation4] sm:$0xff] }
 0x4c8   : > { %1135 = vperm.xlu1 %1403, %v1423_v48   ;;  %v641_v56 = vmul.f32 %v639_v36, %v635_v47 }
 0x4cc   : > { %1404 = vset.pattern.permute.xlu1 %v1457_v54 }
 0x4cd   : > { %1140 = vperm.xlu1 %1404, %v1423_v48  }
 0x4da   : > { %v715_v49 = vpop.f32.mrb[2].mxu0 }
 0x4db   : > { %720 = vrot.lane.b32.xlu0 %v715_v49, %s1458_s10  ;;  %v1335_v50 = vpop.f32.mrb[3].mxu0 }
 0x4e4   : > { %v910_v51 = vpop.f32.mrb[4].mxu0 }
 0x4e5   : > { %915 = vrot.lane.b32.xlu0 %v910_v51, %s1459_s11  ;;  %v1345_v52 = vpop.f32.mrb[5].mxu0 }
 0x4e9   : > { %1029 = vperm.xlu0 %1400, %v1421_v40  }
 0x4ed   : > { %1402 = vset.pattern.permute.xlu0 %v1455_v46 }
 0x4ee   : > { %v1105_v53 = vpop.f32.mrb[6].mxu0 }
 0x4ef   : > { %1110 = vrot.lane.b32.xlu0 %v1105_v53, %s1460_s12  ;;  %v1355_v55 = vpop.f32.mrb[7].mxu0 }
 0x4f3   : > { %1130 = vperm.xlu0 %1402, %v1423_v48  }
 0x4f7   : > { %1405 = vset.pattern.permute.xlu0 %v1457_v54 }
 0x542   : > { %v1126_v4 = vpop.permute.xlu1 %1125 }
 0x547   : > { %v1136_v6 = vpop.permute.xlu1 %1135 }
 0x54c   : > { %v1141_v12 = vpop.permute.xlu1 %1140 }
 0x54d   : > { %v721_v57 = vpop.permute.xlu0 %720 }
 0x54e   : > { %v723_v58 = vadd.f32 %v721_v57, %v641_v56 }
 0x550   : > { %725 = vst.msk [vmem:[#allocation4] sm:$0xff] %vm724_vm10, %v723_v58 }
 0x557   : > { %v831_v60 = vld [vmem:[#allocation4] sm:$0xff]  ;;  %v916_v62 = vpop.permute.xlu0 %915 }
 0x558   : > { %v837_v61 = vmul.f32 %v835_v59, %v831_v60 }
 0x55a   : > { %v918_v63 = vadd.f32 %v916_v62, %v837_v61 }
 0x55c   : > { %920 = vst.msk [vmem:[#allocation4] sm:$0xff] %vm919_vm11, %v918_v63 }
 0x563   : > { %v1026_v1 = vld [vmem:[#allocation4] sm:$0xff] }
 0x568   : > { %v1030_v46 = vpop.permute.xlu0 %1029 }
 0x569   : > { %v1032_v2 = vmul.f32 %v1030_v46, %v1026_v1 }
 0x56c   : > { %v1111_v54 = vpop.permute.xlu0 %1110 }
 0x56d   : > { %v1113_v5 = vadd.f32 %v1111_v54, %v1032_v2 }
 0x56f   : > { %1115 = vst.msk [vmem:[#allocation4] sm:$0xff] %vm1114_vm12, %v1113_v5 }
 0x572   : > { %v1131_v8 = vpop.permute.xlu0 %1130 }
 0x576   : > { %v1122_v7 = vld [vmem:[#allocation4] sm:$0xff] }
 0x577   : > { %v1128_v9 = vmul.f32 %v1126_v4, %v1122_v7  ;;  %v1138_v10 = vmul.f32 %v1136_v6, %v1122_v7  ;;  %v1133_v11 = vmul.f32 %v1131_v8, %v1122_v7  ;;  %v1143_v13 = vmul.f32 %v1141_v12, %v1122_v7 }
 0x579   : > { %v1144_v14 = vsel %vm342_vm1, %v1128_v9, %v1133_v11 }
 0x57a   : > { %v1146_v15 = vsel %vm1145_vm13, %v1144_v14, %v1138_v10 }
 0x57b   : > { %v1148_v16 = vsel %vm1147_vm14, %v1146_v15, %v1143_v13 }
 0x57c   : > { %1150 = vst.msk [vmem:[%s325_s15] sm:$0xff] %vm335_vm8, %v1148_v16 }
 0x57d PF: > { %s14_s17 = sadd.s32 1, %s1446_s17   ;;  %s1675_s15 = smov %s1442_s16 }
 0x57e   : > { %p11_p5 = scmp.ge.s32.totalorder %s14_s17, 4   ;;  %s1676_s16 = smov %s1678_s18 }
 0x580   :  { %13 = sbr.rel (!%p11_p5) target bundleno = 2 (0x2), region = 83 }

// kernel: encoder_block.12
= control target key start
LH: loop header
LB: loop body
LE: loop exit
PB: predicated region body
PF: predicated region fallthrough
CT: control target
= control target key end

     0   :  { %vm29_vm0 = vcmask 261120   ;;  %vm18_vm1 = vcmask 523264   ;;  %v167_v3 = vmov 0.0   ;;  %s223_s1 = inlined_call_operand.vmem [shape: f32[32,64], index: 1, kind: input, shape index: {}]   ;;  %s224_s0 = inlined_call_operand.vmem [shape: f32[16,32], index: 0, kind: input, shape index: {}]   ;;  %s225_s2 = inlined_call_operand.vmem [shape: f32[1,64], index: 2, kind: input, shape index: {}]   ;;  %s226_s3 = inlined_call_operand.vmem [shape: f32[16,64], index: 3, kind: output, shape index: {}]  }
   0x1   :  { %v25_v0 = vld [vmem:[%s223_s1] sm:$0xff]  ;;  %v26_v1 = vld [vmem:[%s223_s1 + $0x8] sm:$0xff]  ;;  %v27_v2 = vld [vmem:[%s223_s1 + $0x10] sm:$0xff]  ;;  %20 = vst.msk [vmem:[#allocation2 + $0x8] sm:$0xff] %vm18_vm1, %v167_v3 }
   0x2   :  { %19 = vst.msk [vmem:[#allocation2] sm:$0xff] %vm18_vm1, %v167_v3  ;;  %v158_v4 = vpack.c.bf16 %v26_v1, %v25_v0  ;;  %v28_v5 = vld [vmem:[%s223_s1 + $0x18] sm:$0xff]  ;;  %v23_v6 = vld [vmem:[%s224_s0] sm:$0xff]  ;;  %v24_v8 = vld [vmem:[%s224_s0 + $0x8] sm:$0xff] }
   0x3   :  { %v162_v7 = vpack.c.bf16 %v28_v5, %v27_v2  ;;  %155 = vmatprep.mubr.msk.f32.mxu0 %vm29_vm0, %v23_v6  ;;  %v140_v15 = vld [vmem:[%s225_s2] ss:$0 sm:$0xff] }
   0x4   :  { %159 = vmatprep.subr.bf16.mxu0 %v158_v4 }
   0x5   :  { %161 = vmatpush3.bf16.msra.mxu0 %v158_v4 }
   0x6   :  { %163 = vmatprep.subr.bf16.mxu0 %v162_v7 }
   0x8   :  { %v22_v9 = vld [vmem:[#allocation2 + $0x8] sm:$0xff] }
   0x9   :  { %165 = vmatpush3.bf16.msra.mxu0 %v162_v7  ;;  %v21_v10 = vld [vmem:[#allocation2] sm:$0xff] }
   0xc   :  { %156 = vmatmul.mubr.msk.f32.vlgmr.msra.gmra.mrb[0].mxu0 %vm29_vm0, %v24_v8 }
  0xdf   :  { %v157_v11 = vpop.f32.mrb[0].mxu0 }
  0xe0   :  { %v112_v12 = vadd.f32 %v157_v11, %v22_v9  ;;  %v102_v13 = vpop.f32.mrb[1].mxu0 }
  0xe1   :  { %v111_v14 = vadd.f32 %v102_v13, %v21_v10 }
  0xe2   :  { %115 = vst.msk [vmem:[#allocation2 + $0x8] sm:$0xff] %vm18_vm1, %v112_v12 }
  0xe3   :  { %114 = vst.msk [vmem:[#allocation2] sm:$0xff] %vm18_vm1, %v111_v14 }
  0xe9   :  { %v120_v16 = vld [vmem:[#allocation2 + $0x8] sm:$0xff] }
  0xea   :  { %v129_v17 = vadd.f32 %v140_v15, %v120_v16  ;;  %v119_v18 = vld [vmem:[#allocation2] sm:$0xff] }
  0xeb   :  { %v128_v19 = vadd.f32 %v140_v15, %v119_v18 }
  0xec   :  { %v131_v20 = vmax.f32 %v129_v17, 0.0 }
  0xed   :  { %v130_v21 = vmax.f32 %v128_v19, 0.0 }
  0xee   :  { %133 = vst.msk [vmem:[%s226_s3 + $0x8] sm:$0xff] %vm18_vm1, %v131_v20 }
  0xef   :  { %132 = vst.msk [vmem:[%s226_s3] sm:$0xff] %vm18_vm1, %v130_v21 }

// kernel: encoder_block.13
= control target key start
LH: loop header
LB: loop body
LE: loop exit
PB: predicated region body
PF: predicated region fallthrough
CT: control target
= control target key end

     0   :  { %vm37_vm0 = vcmask 523264   ;;  %vm22_vm1 = vcmask 261120   ;;  %v236_v5 = vmov 0.0   ;;  %s324_s0 = inlined_call_operand.vmem [shape: f32[16,64], index: 0, kind: input, shape index: {}]   ;;  %s325_s1 = inlined_call_operand.vmem [shape: f32[64,32], index: 1, kind: input, shape index: {}]   ;;  %s326_s2 = inlined_call_operand.vmem [shape: f32[1,32], index: 2, kind: input, shape index: {}]   ;;  %s327_s3 = inlined_call_operand.vmem [shape: f32[16,32], index: 3, kind: input, shape index: {}]   ;;  %s328_s4 = inlined_call_operand.hbm [shape: f32[16,32], index: 4, kind: output, shape index: {}]  }
   0x1   :  { %v29_v0 = vld [vmem:[%s325_s1] sm:$0xff]  ;;  %v30_v1 = vld [vmem:[%s325_s1 + $0x8] sm:$0xff]  ;;  %v31_v2 = vld [vmem:[%s325_s1 + $0x10] sm:$0xff]  ;;  %24 = vst.msk [vmem:[#allocation2 + $0x8] sm:$0xff] %vm22_vm1, %v236_v5 }
   0x2   :  { %v192_v3 = vpack.c.bf16 %v30_v1, %v29_v0  ;;  %v32_v4 = vld [vmem:[%s325_s1 + $0x18] sm:$0xff]  ;;  %23 = vst.msk [vmem:[#allocation2] sm:$0xff] %vm22_vm1, %v236_v5  ;;  %v33_v7 = vld [vmem:[%s325_s1 + $0x20] sm:$0xff]  ;;  %v34_v8 = vld [vmem:[%s325_s1 + $0x28] sm:$0xff] }
   0x3   :  { %v196_v6 = vpack.c.bf16 %v32_v4, %v31_v2  ;;  %v27_v9 = vld [vmem:[%s324_s0] sm:$0xff] }
   0x4   :  { %193 = vmatprep.subr.bf16.mxu0 %v192_v3  ;;  %189 = vmatprep.mubr.msk.f32.mxu0 %vm37_vm0, %v27_v9 }
   0x5   :  { %9 = vsyncpa [#allocation4], 0  ;;  %195 = vmatpush3.bf16.msra.mxu0 %v192_v3  ;;  %v200_v10 = vpack.c.bf16 %v34_v8, %v33_v7  ;;  %v35_v11 = vld [vmem:[%s325_s1 + $0x30] sm:$0xff]  ;;  %v36_v12 = vld [vmem:[%s325_s1 + $0x38] sm:$0xff] }
   0x6   :  { %197 = vmatprep.subr.bf16.mxu0 %v196_v6  ;;  %v204_v13 = vpack.c.bf16 %v36_v12, %v35_v11  ;;  %v28_v14 = vld [vmem:[%s324_s0 + $0x8] sm:$0xff]  ;;  %v162_v21 = vld [vmem:[%s326_s2] ss:$0 sm:$0xff]  ;;  %s237_s0 = smov [#allocation3]  }
   0x7   :  { %v139_v23 = vld [vmem:[%s327_s3 + $0x8] sm:$0xff]  ;;  %s149_s12 = sshll.u32 %s237_s0, 4  ;;  %v138_v26 = vld [vmem:[%s327_s3] sm:$0xff]  ;;  %s150_s12 = int_to_ptr.vmem [resolvable:$true] %s149_s12 }
   0x8   :  { %v26_v15 = vld [vmem:[#allocation2 + $0x8] sm:$0xff]  ;;  %s212_s2 = scalar_lea.vmem %s150_s12, 256  ;;  %p217_p1 = scmp.lt.s32.totalorder %s150_s12, %s150_s12 }
   0x9   :  { %199 = vmatpush3.bf16.msra.mxu0 %v196_v6  ;;  %v25_v16 = vld [vmem:[#allocation2] sm:$0xff]  ;;  %p213_p0 = scmp.ne.s32.totalorder %s150_s12, %s212_s2  ;;  %p218_p2 = scmp.lt.s32.totalorder %s212_s2, %s212_s2 }
   0xa   :  { %201 = vmatprep.subr.bf16.mxu0 %v200_v10 }
   0xb   :  { %p219_p3 = por %p218_p2, %p217_p1 }
   0xd   :  { %203 = vmatpush3.bf16.msra.mxu0 %v200_v10  ;;  %p220_p4 = pnand %p219_p3, %p213_p0 }
   0xe   :  { %205 = vmatprep.subr.bf16.mxu0 %v204_v13 }
  0x11   :  { %207 = vmatpush3.bf16.msra.mxu0 %v204_v13 }
  0x14   :  { %190 = vmatmul.mubr.msk.f32.vlgmr.msra.gmra.mrb[0].mxu0 %vm37_vm0, %v28_v14 }
  0xe7   :  { %v191_v17 = vpop.f32.mrb[0].mxu0 }
  0xe8   :  { %v120_v18 = vadd.f32 %v191_v17, %v26_v15  ;;  %v110_v19 = vpop.f32.mrb[1].mxu0 }
  0xe9   :  { %v119_v20 = vadd.f32 %v110_v19, %v25_v16 }
  0xea   :  { %123 = vst.msk [vmem:[#allocation2 + $0x8] sm:$0xff] %vm22_vm1, %v120_v18 }
  0xeb   :  { %122 = vst.msk [vmem:[#allocation2] sm:$0xff] %vm22_vm1, %v119_v20 }
  0xf1   :  { %v128_v22 = vld [vmem:[#allocation2 + $0x8] sm:$0xff] }
  0xf2   :  { %v127_v24 = vld [vmem:[#allocation2] sm:$0xff]  ;;  %v137_v25 = vadd.f32 %v162_v21, %v128_v22 }
  0xf3   :  { %v136_v27 = vadd.f32 %v162_v21, %v127_v24 }
  0xf4   :  { %v141_v28 = vadd.f32 %v139_v23, %v137_v25 }
  0xf5   :  { %v140_v29 = vadd.f32 %v138_v26, %v136_v27 }
  0xf6   :  { %143 = vst.msk [vmem:[#allocation3 + $0x8] sm:$0xff] %vm22_vm1, %v141_v28 }
  0xf7   :  { %142 = vst.msk [vmem:[#allocation3] sm:$0xff] %vm22_vm1, %v140_v29 }
  0xf8   :  { %223 = shalt.err (!%p220_p4)
}
  0xf9   :  { %s224_s17 = scalar_lea.hbm %s328_s4, 256 }
  0xfa   :  { %p225_p5 = scmp.ne.s32.totalorder %s328_s4, %s224_s17  ;;  %p228_p6 = scmp.lt.u32.totalorder %s224_s17, %s328_s4 }
  0xfc   :  { %p230_p7 = pnand %p228_p6, %p225_p5 }
  0xfe   :  { %233 = shalt.err (!%p230_p7)
}
  0xff   :  { %s238_s21 = smov 128   ;;  %s239_s22 = smov 8  }
 0x100   :  { %155 = dma.vmem_to_hbm [thread:$0]  %s150_s12, 256, %s328_s4, [#allocation4], %s238_s21, %s238_s21, %s239_s22  }
 0x101   :  { %234 = dma.done.wait [#allocation4], 256  }
 0x102   :  { %235 = vsyncadd [#allocation4], 4294967040 }
 0x103   :  { %159 = vsyncpa [#allocation4], 1 }

</bundles_post_ra>
